<compile_context>
chip_gen: v5e
topology: v5e:2x2
jax: 0.10.0
libtpu: 0.0.40
codegen_flags: <defaults>
</compile_context>

<pallas_src>
import functools
import math

import jax
import jax.numpy as jnp
from jax.experimental import pallas as pl
from jax.experimental.pallas import tpu as pltpu


_LN_EPS = 1e-5                       # nn.LayerNorm default
_FUSE_BUDGET = 24 * 1024 * 1024      # max fused-kernel tile footprint before falling back


def _round_up(x, m):
    return (x + m - 1) // m * m


def _pad2d(x, rows, cols, dtype=None):
    """Optionally cast and pad to (rows, cols); no copy when already aligned."""
    if dtype is not None and x.dtype != dtype:
        x = x.astype(dtype)
    r, c = x.shape
    if (r, c) == (rows, cols):
        return x
    return jnp.pad(x, ((0, rows - r), (0, cols - c)))


def _vmem_limit(tile_bytes):
    """Scoped-VMEM request derived from the tile footprint + slack, safe on v5e/v6e/v7x."""
    return int(min(max(2 * tile_bytes + (4 << 20), 32 << 20), 48 << 20))


def _row_tiling(m):
    """Pad rows to a multiple of 8 and pick a row-tile <= 256."""
    mp = _round_up(m, 8)
    if mp > 256:
        tm = 256
        mp = _round_up(m, tm)
    else:
        tm = mp
    return mp, tm


# ---------------------------------------------------------------------------
# General tiled matmul:  out = act(A @ B + bias), out_dtype selectable
# ---------------------------------------------------------------------------

def _matmul_kernel(a_ref, b_ref, bias_ref, o_ref, acc_ref, *, activation, nk):
    dot = jnp.dot(a_ref[...].astype(jnp.bfloat16), b_ref[...].astype(jnp.bfloat16),
                  preferred_element_type=jnp.float32)
    if nk == 1:
        # single K step: no accumulator pass at all
        r = dot + bias_ref[...]
        if activation == "relu":
            r = jnp.maximum(r, 0.0)
        o_ref[...] = r.astype(o_ref.dtype)
    else:
        k = pl.program_id(2)

        @pl.when(k == 0)
        def _():
            acc_ref[...] = dot

        @pl.when(jnp.logical_and(k > 0, k < nk - 1))
        def _():
            acc_ref[...] += dot

        @pl.when(k == nk - 1)
        def _():
            # fold final dot + bias + activation into one pass (no extra RMW on last step)
            r = acc_ref[...] + dot + bias_ref[...]
            if activation == "relu":
                r = jnp.maximum(r, 0.0)
            o_ref[...] = r.astype(o_ref.dtype)


def pallas_matmul(a, b, bias=None, activation=None, out_dtype=jnp.float32):
    """act(A @ B + bias).  A:(M,K)  B:(K,N)  bias:(N,)."""
    M, K = a.shape
    K2, N = b.shape
    assert K == K2, (a.shape, b.shape)
    if bias is None:
        bias = jnp.zeros((N,), jnp.float32)

    Kp = _round_up(K, 128)
    Np = _round_up(N, 128)
    Mp, tm = _row_tiling(M)

    # Largest-possible reduction tile (fewest K steps / accumulator passes).
    if Kp <= 2048:
        tk = Kp
    else:
        tk = next(c for c in (2048, 1024, 512, 256, 128) if Kp % c == 0)

    # Lane-dense full-width N when it fits; when M is skinny expose >= 2 N blocks so
    # both TensorCores on v7x can be used (cheap on 1-TC chips).
    if Np <= 2048:
        tn = Np
        if Mp // tm == 1 and Np >= 512 and (Np // 2) % 128 == 0:
            tn = Np // 2
    else:
        tn = next(c for c in (2048, 1024, 512, 256, 128) if Np % c == 0)

    a_p = _pad2d(a, Mp, Kp)                                   # dtype preserved; cast in-kernel
    b_p = _pad2d(b, Kp, Np)
    bias_p = _pad2d(bias.reshape(1, N).astype(jnp.float32), 1, Np)

    nk = Kp // tk
    grid = (Mp // tm, Np // tn, nk)
    o_bytes = jnp.dtype(out_dtype).itemsize
    tile_bytes = (2 * (tm * tk * a_p.dtype.itemsize + tk * tn * b_p.dtype.itemsize + tn * 4)
                  + 2 * tm * tn * o_bytes + tm * tn * 4)

    out = pl.pallas_call(
        functools.partial(_matmul_kernel, activation=activation, nk=nk),
        out_shape=jax.ShapeDtypeStruct((Mp, Np), out_dtype),
        grid_spec=pltpu.PrefetchScalarGridSpec(
            num_scalar_prefetch=0,
            grid=grid,
            in_specs=[pl.BlockSpec((tm, tk), lambda m, n, k: (m, k)),
                      pl.BlockSpec((tk, tn), lambda m, n, k: (k, n)),
                      pl.BlockSpec((1, tn), lambda m, n, k: (0, n))],
            out_specs=pl.BlockSpec((tm, tn), lambda m, n, k: (m, n)),
            scratch_shapes=[pltpu.VMEM((tm, tn), jnp.float32)]),
        compiler_params=pltpu.CompilerParams(
            dimension_semantics=("parallel", "parallel", "arbitrary"),
            vmem_limit_bytes=_vmem_limit(tile_bytes)),
    )(a_p, b_p, bias_p)

    if (Mp, Np) != (M, N):
        out = out[:M, :N]
    return out


# ---------------------------------------------------------------------------
# Fallback: residual-add + LayerNorm (only used when fused paths exceed VMEM)
# ---------------------------------------------------------------------------

def _residual_layernorm_kernel(x_ref, r_ref, g_ref, b_ref, o_ref):
    y = x_ref[...].astype(jnp.float32) + r_ref[...].astype(jnp.float32)
    mean = jnp.mean(y, axis=-1, keepdims=True)
    c = y - mean
    var = jnp.mean(c * c, axis=-1, keepdims=True)
    o_ref[...] = c * jax.lax.rsqrt(var + _LN_EPS) * g_ref[...] + b_ref[...]


def pallas_residual_layernorm(x, res, gamma, beta):
    R, D = x.shape
    Rp, tr = _row_tiling(R)
    x_p = _pad2d(x.astype(jnp.float32), Rp, D)
    r_p = _pad2d(res.astype(jnp.float32), Rp, D)
    out = pl.pallas_call(
        _residual_layernorm_kernel,
        out_shape=jax.ShapeDtypeStruct((Rp, D), jnp.float32),
        grid_spec=pltpu.PrefetchScalarGridSpec(
            num_scalar_prefetch=0,
            grid=(Rp // tr,),
            in_specs=[pl.BlockSpec((tr, D), lambda i: (i, 0)),
                      pl.BlockSpec((tr, D), lambda i: (i, 0)),
                      pl.BlockSpec((1, D), lambda i: (0, 0)),
                      pl.BlockSpec((1, D), lambda i: (0, 0))],
            out_specs=pl.BlockSpec((tr, D), lambda i: (i, 0))),
        compiler_params=pltpu.CompilerParams(
            dimension_semantics=("parallel",),
            vmem_limit_bytes=_vmem_limit(6 * tr * D * 4)),
    )(x_p, r_p, gamma.reshape(1, D).astype(jnp.float32),
      beta.reshape(1, D).astype(jnp.float32))
    return out[:R] if Rp != R else out


# ---------------------------------------------------------------------------
# Fused GEMM + residual-add + LayerNorm:  out = LN(res + A @ W + bias)
# (used for the attention output projection -> norm1)
# ---------------------------------------------------------------------------

def _gemm_res_ln_kernel(a_ref, w_ref, bias_ref, res_ref, g_ref, b_ref, o_ref):
    dot = jnp.dot(a_ref[...].astype(jnp.bfloat16), w_ref[...].astype(jnp.bfloat16),
                  preferred_element_type=jnp.float32)
    y = res_ref[...].astype(jnp.float32) + dot + bias_ref[...]
    mean = jnp.mean(y, axis=-1, keepdims=True)
    c = y - mean
    var = jnp.mean(c * c, axis=-1, keepdims=True)
    o_ref[...] = (c * jax.lax.rsqrt(var + _LN_EPS) * g_ref[...]
                  + b_ref[...]).astype(o_ref.dtype)


def gemm_residual_layernorm(a, w, bias, res, gamma, beta):
    M, K = a.shape
    K2, N = w.shape
    assert K == K2 and res.shape == (M, N)
    Mp, tm = _row_tiling(M)

    tile_bytes = (2 * (tm * K * a.dtype.itemsize + K * N * w.dtype.itemsize
                       + tm * N * 4 + 3 * N * 4)
                  + 2 * tm * N * 4)
    if tile_bytes > _FUSE_BUDGET:
        # working set too large for one fused call: fall back to separate kernels
        y = pallas_matmul(a, w, bias)
        return pallas_residual_layernorm(res, y, gamma, beta)

    a_p = _pad2d(a, Mp, K)
    r_p = _pad2d(res.astype(jnp.float32), Mp, N)

    out = pl.pallas_call(
        _gemm_res_ln_kernel,
        out_shape=jax.ShapeDtypeStruct((Mp, N), jnp.float32),
        grid_spec=pltpu.PrefetchScalarGridSpec(
            num_scalar_prefetch=0,
            grid=(Mp // tm,),
            in_specs=[pl.BlockSpec((tm, K), lambda i: (i, 0)),
                      pl.BlockSpec((K, N), lambda i: (0, 0)),
                      pl.BlockSpec((1, N), lambda i: (0, 0)),
                      pl.BlockSpec((tm, N), lambda i: (i, 0)),
                      pl.BlockSpec((1, N), lambda i: (0, 0)),
                      pl.BlockSpec((1, N), lambda i: (0, 0))],
            out_specs=pl.BlockSpec((tm, N), lambda i: (i, 0))),
        compiler_params=pltpu.CompilerParams(
            dimension_semantics=("parallel",),
            vmem_limit_bytes=_vmem_limit(tile_bytes)),
    )(a_p, w, bias.reshape(1, N).astype(jnp.float32), r_p,
      gamma.reshape(1, N).astype(jnp.float32), beta.reshape(1, N).astype(jnp.float32))
    return out[:M] if Mp != M else out


# ---------------------------------------------------------------------------
# Fused FFN + residual-add + LayerNorm:
#   out = LN(x + ReLU(x @ W1 + b1) @ W2 + b2)       (linear1/ReLU/linear2 -> norm2)
# ---------------------------------------------------------------------------

def _ffn_res_ln_kernel(x_ref, w1_ref, b1_ref, w2_ref, b2_ref, g_ref, b_ref, o_ref):
    x = x_ref[...].astype(jnp.float32)
    h = jnp.dot(x.astype(jnp.bfloat16), w1_ref[...].astype(jnp.bfloat16),
                preferred_element_type=jnp.float32)
    h = jnp.maximum(h + b1_ref[...], 0.0)                      # intermediate stays in VMEM
    y = jnp.dot(h.astype(jnp.bfloat16), w2_ref[...].astype(jnp.bfloat16),
                preferred_element_type=jnp.float32)
    y = x + y + b2_ref[...]
    mean = jnp.mean(y, axis=-1, keepdims=True)
    c = y - mean
    var = jnp.mean(c * c, axis=-1, keepdims=True)
    o_ref[...] = (c * jax.lax.rsqrt(var + _LN_EPS) * g_ref[...]
                  + b_ref[...]).astype(o_ref.dtype)


def ffn_residual_layernorm(x, w1, b1, w2, b2, gamma, beta):
    M, E = x.shape
    E1, F = w1.shape
    F2, E2 = w2.shape
    assert E1 == E and F2 == F and E2 == E
    Mp, tm = _row_tiling(M)

    tile_bytes = (2 * (tm * E * 4 + E * F * w1.dtype.itemsize + F * E * w2.dtype.itemsize
                       + F * 4 + 3 * E * 4)
                  + 2 * tm * E * 4 + tm * F * 4)
    if tile_bytes > _FUSE_BUDGET:
        # fall back: two GEMMs (bf16 intermediate) + separate residual-LN kernel
        h = pallas_matmul(x, w1, b1, activation="relu", out_dtype=jnp.bfloat16)
        y = pallas_matmul(h, w2, b2)
        return pallas_residual_layernorm(x, y, gamma, beta)

    x_p = _pad2d(x.astype(jnp.float32), Mp, E)

    out = pl.pallas_call(
        _ffn_res_ln_kernel,
        out_shape=jax.ShapeDtypeStruct((Mp, E), jnp.float32),
        grid_spec=pltpu.PrefetchScalarGridSpec(
            num_scalar_prefetch=0,
            grid=(Mp // tm,),
            in_specs=[pl.BlockSpec((tm, E), lambda i: (i, 0)),
                      pl.BlockSpec((E, F), lambda i: (0, 0)),
                      pl.BlockSpec((1, F), lambda i: (0, 0)),
                      pl.BlockSpec((F, E), lambda i: (0, 0)),
                      pl.BlockSpec((1, E), lambda i: (0, 0)),
                      pl.BlockSpec((1, E), lambda i: (0, 0)),
                      pl.BlockSpec((1, E), lambda i: (0, 0))],
            out_specs=pl.BlockSpec((tm, E), lambda i: (i, 0))),
        compiler_params=pltpu.CompilerParams(
            dimension_semantics=("parallel",),
            vmem_limit_bytes=_vmem_limit(tile_bytes)),
    )(x_p, w1, b1.reshape(1, F).astype(jnp.float32), w2,
      b2.reshape(1, E).astype(jnp.float32),
      gamma.reshape(1, E).astype(jnp.float32), beta.reshape(1, E).astype(jnp.float32))
    return out[:M] if Mp != M else out


# ---------------------------------------------------------------------------
# Multi-head self-attention + encoder layer (eval mode)
# ---------------------------------------------------------------------------

def _attention_core(qkv, L, B, E, nhead):
    """Scaled dot-product attention on the fused QKV output.  qkv: (L*B, 3E) bf16."""
    hd = E // nhead
    scale = 1.0 / math.sqrt(hd)
    qkv = qkv.reshape(L, B, 3, nhead, hd)
    q, k, v = qkv[:, :, 0], qkv[:, :, 1], qkv[:, :, 2]           # (L, B, H, hd) bf16
    # TODO(synk): replace the score/softmax/context einsums with a Pallas
    # flash-attention kernel once L / head_dim reach (8,128)-tile scale; at L=16,
    # hd=32 the fused GEMM kernels dominate and this XLA core is negligible.
    scores = jnp.einsum('lbhd,sbhd->bhls', q, k,
                        preferred_element_type=jnp.float32) * scale
    attn = jax.nn.softmax(scores, axis=-1)
    ctx = jnp.einsum('bhls,sbhd->lbhd', attn.astype(v.dtype), v,
                     preferred_element_type=jnp.float32)
    return ctx.reshape(L * B, E)                                  # (L*B, E) f32


def transformer_encoder_layer(params, src, nhead):
    """Post-norm TransformerEncoderLayer forward, eval mode (dropout = identity)."""
    L, B, E = src.shape
    x2d = src.reshape(L * B, E).astype(jnp.float32)

    # --- self-attention block:  src = norm1(src + out_proj(attn(qkv))) ---
    # Fused Q/K/V projection (single (E,3E) GEMM), bf16 output feeds the attention core.
    qkv = pallas_matmul(x2d, params['w_qkv'], params['b_qkv'], out_dtype=jnp.bfloat16)
    ctx = _attention_core(qkv, L, B, E, nhead)
    # output projection + residual add + LayerNorm1 in ONE kernel
    x2d = gemm_residual_layernorm(ctx, params['w_out'], params['b_out'],
                                  x2d, params['ln1_g'], params['ln1_b'])

    # --- FFN block:  src = norm2(src + linear2(relu(linear1(src)))) in ONE kernel ---
    x2d = ffn_residual_layernorm(x2d, params['w1'], params['b1'],
                                 params['w2'], params['b2'],
                                 params['ln2_g'], params['ln2_b'])

    return x2d.reshape(L, B, E)


# ---------------------------------------------------------------------------
# Deterministic parameter construction
# ---------------------------------------------------------------------------

def init_params(key, d_model, nhead, dim_feedforward):
    assert d_model % nhead == 0
    ks = jax.random.split(key, 7)
    s_e = 1.0 / math.sqrt(d_model)
    s_f = 1.0 / math.sqrt(dim_feedforward)
    # Weights stored pre-transposed to (in, out), pre-cast to bf16 (MXU-native) and
    # already (8,128)-aligned, so the kernels never pad or re-cast them per call.
    # NOTE: PyTorch's in_proj_weight is (3E, E) with q/k/v stacked along dim 0; a real
    # checkpoint port must transpose and preserve that q,k,v ordering.
    return {
        'w_qkv': (s_e * jax.random.normal(ks[0], (d_model, 3 * d_model), jnp.float32)
                  ).astype(jnp.bfloat16),
        'b_qkv': 0.02 * jax.random.normal(ks[1], (3 * d_model,), jnp.float32),
        'w_out': (s_e * jax.random.normal(ks[2], (d_model, d_model), jnp.float32)
                  ).astype(jnp.bfloat16),
        'b_out': jnp.zeros((d_model,), jnp.float32),
        'w1': (s_e * jax.random.normal(ks[3], (d_model, dim_feedforward), jnp.float32)
               ).astype(jnp.bfloat16),
        'b1': 0.02 * jax.random.normal(ks[4], (dim_feedforward,), jnp.float32),
        'w2': (s_f * jax.random.normal(ks[5], (dim_feedforward, d_model), jnp.float32)
               ).astype(jnp.bfloat16),
        'b2': 0.02 * jax.random.normal(ks[6], (d_model,), jnp.float32),
        'ln1_g': jnp.ones((d_model,), jnp.float32),
        'ln1_b': jnp.zeros((d_model,), jnp.float32),
        'ln2_g': jnp.ones((d_model,), jnp.float32),
        'ln2_b': jnp.zeros((d_model,), jnp.float32),
    }


if __name__ == "__main__":
    key = jax.random.PRNGKey(0)
    pkey, xkey = jax.random.split(key)

    d_model, nhead, dim_feedforward = 256, 8, 512
    seq_len, batch = 16, 2

    params = init_params(pkey, d_model, nhead, dim_feedforward)
    # nn.MultiheadAttention default is batch_first=False -> src is (L, B, E).
    src = jax.random.normal(xkey, (seq_len, batch, d_model), jnp.float32)

    fwd = jax.jit(functools.partial(transformer_encoder_layer, nhead=nhead))
    out = jax.block_until_ready(fwd(params, src))

    assert out.shape == (seq_len, batch, d_model), out.shape
    assert bool(jnp.isfinite(out).all())
    print("KERNEL_OK")
</pallas_src>

<mosaic_0001>
module attributes {stable_mosaic.version = 11 : i64} {
  func.func @_matmul_kernel(%arg0: i32, %arg1: i32, %arg2: i32, %arg3: memref<32x256xf32, #tpu.memory_space<vmem>>, %arg4: memref<256x384xbf16, #tpu.memory_space<vmem>>, %arg5: memref<1x384xf32, #tpu.memory_space<vmem>>, %arg6: memref<32x384xbf16, #tpu.memory_space<vmem>>, %arg7: memref<32x384xf32, #tpu.memory_space<vmem>>) attributes {dimension_semantics = [#tpu.dimension_semantics<parallel>, #tpu.dimension_semantics<parallel>, #tpu.dimension_semantics<arbitrary>], iteration_bounds = array<i64: 1, 2, 1>, scalar_prefetch = 0 : i64, scratch_operands = 1 : i64, tpu.core_type = #tpu.core_type<tc>, window_params = [{transform_indices = @transform_0, window_bounds = array<i64: 32, 256>}, {transform_indices = @transform_1, window_bounds = array<i64: 256, 384>}, {transform_indices = @transform_2, window_bounds = array<i64: 1, 384>}, {transform_indices = @transform_3, window_bounds = array<i64: 32, 384>}]} {
    %c0 = arith.constant 0 : index
    %c0_0 = arith.constant 0 : index
    %0 = vector.load %arg3[%c0, %c0_0] : memref<32x256xf32, #tpu.memory_space<vmem>>, vector<32x256xf32>
    %1 = arith.truncf %0 : vector<32x256xf32> to vector<32x256xbf16>
    %c0_1 = arith.constant 0 : index
    %c0_2 = arith.constant 0 : index
    %2 = vector.load %arg4[%c0_1, %c0_2] : memref<256x384xbf16, #tpu.memory_space<vmem>>, vector<256x384xbf16>
    %cst = arith.constant dense<0.000000e+00> : vector<32x384xf32>
    %3 = tpu.matmul %1, %2, %cst {dimension_numbers = #tpu.dot_dimension_numbers<[1], [0], [0], [1], [0, 0, 1, 1], [], []>} : vector<32x256xbf16>, vector<256x384xbf16>, vector<32x384xf32> -> vector<32x384xf32>
    %c0_3 = arith.constant 0 : index
    %c0_4 = arith.constant 0 : index
    %4 = vector.load %arg5[%c0_3, %c0_4] : memref<1x384xf32, #tpu.memory_space<vmem>>, vector<1x384xf32>
    %5 = vector.broadcast %4 : vector<1x384xf32> to vector<32x384xf32>
    %6 = arith.addf %3, %5 : vector<32x384xf32>
    %7 = arith.truncf %6 : vector<32x384xf32> to vector<32x384xbf16>
    %c0_5 = arith.constant 0 : index
    %c0_6 = arith.constant 0 : index
    %8 = vector.load %arg6[%c0_5, %c0_6] : memref<32x384xbf16, #tpu.memory_space<vmem>>, vector<32x384xbf16>
    tpu.vector_store %arg6[%c0_5, %c0_6], %7 {strides = array<i32>} : memref<32x384xbf16, #tpu.memory_space<vmem>>, vector<32x384xbf16>,
    return
  }
  func.func @transform_0(%arg0: i32, %arg1: i32, %arg2: i32) -> (i32, i32) {
    %c0_i32 = arith.constant 0 : i32
    return %arg0, %arg2 : i32, i32
  }
  func.func @transform_1(%arg0: i32, %arg1: i32, %arg2: i32) -> (i32, i32) {
    %c0_i32 = arith.constant 0 : i32
    return %arg2, %arg1 : i32, i32
  }
  func.func @transform_2(%arg0: i32, %arg1: i32, %arg2: i32) -> (i32, i32) {
    %c0_i32 = arith.constant 0 : i32
    %c0_i32_0 = arith.constant 0 : i32
    return %c0_i32, %arg1 : i32, i32
  }
  func.func @transform_3(%arg0: i32, %arg1: i32, %arg2: i32) -> (i32, i32) {
    %c0_i32 = arith.constant 0 : i32
    return %arg0, %arg1 : i32, i32
  }
}

module attributes {stable_mosaic.version = 11 : i64} {
  func.func @_ffn_res_ln_kernel(%arg0: i32, %arg1: memref<32x256xf32, #tpu.memory_space<vmem>>, %arg2: memref<256x512xbf16, #tpu.memory_space<vmem>>, %arg3: memref<1x512xf32, #tpu.memory_space<vmem>>, %arg4: memref<512x256xbf16, #tpu.memory_space<vmem>>, %arg5: memref<1x256xf32, #tpu.memory_space<vmem>>, %arg6: memref<1x256xf32, #tpu.memory_space<vmem>>, %arg7: memref<1x256xf32, #tpu.memory_space<vmem>>, %arg8: memref<32x256xf32, #tpu.memory_space<vmem>>) attributes {dimension_semantics = [#tpu.dimension_semantics<parallel>], iteration_bounds = array<i64: 1>, scalar_prefetch = 0 : i64, scratch_operands = 0 : i64, tpu.core_type = #tpu.core_type<tc>, window_params = [{transform_indices = @transform_0, window_bounds = array<i64: 32, 256>}, {pipeline_mode = #tpu.pipeline_mode<synchronous>, transform_indices = @transform_1, window_bounds = array<i64: 256, 512>}, {pipeline_mode = #tpu.pipeline_mode<synchronous>, transform_indices = @transform_2, window_bounds = array<i64: 1, 512>}, {pipeline_mode = #tpu.pipeline_mode<synchronous>, transform_indices = @transform_3, window_bounds = array<i64: 512, 256>}, {pipeline_mode = #tpu.pipeline_mode<synchronous>, transform_indices = @transform_4, window_bounds = array<i64: 1, 256>}, {pipeline_mode = #tpu.pipeline_mode<synchronous>, transform_indices = @transform_5, window_bounds = array<i64: 1, 256>}, {pipeline_mode = #tpu.pipeline_mode<synchronous>, transform_indices = @transform_6, window_bounds = array<i64: 1, 256>}, {transform_indices = @transform_7, window_bounds = array<i64: 32, 256>}]} {
    %c0 = arith.constant 0 : index
    %c0_0 = arith.constant 0 : index
    %0 = vector.load %arg1[%c0, %c0_0] : memref<32x256xf32, #tpu.memory_space<vmem>>, vector<32x256xf32>
    %1 = arith.truncf %0 : vector<32x256xf32> to vector<32x256xbf16>
    %c0_1 = arith.constant 0 : index
    %c0_2 = arith.constant 0 : index
    %2 = vector.load %arg2[%c0_1, %c0_2] : memref<256x512xbf16, #tpu.memory_space<vmem>>, vector<256x512xbf16>
    %cst = arith.constant dense<0.000000e+00> : vector<32x512xf32>
    %3 = tpu.matmul %1, %2, %cst {dimension_numbers = #tpu.dot_dimension_numbers<[1], [0], [0], [1], [0, 0, 1, 1], [], []>} : vector<32x256xbf16>, vector<256x512xbf16>, vector<32x512xf32> -> vector<32x512xf32>
    %c0_3 = arith.constant 0 : index
    %c0_4 = arith.constant 0 : index
    %4 = vector.load %arg3[%c0_3, %c0_4] : memref<1x512xf32, #tpu.memory_space<vmem>>, vector<1x512xf32>
    %5 = vector.broadcast %4 : vector<1x512xf32> to vector<32x512xf32>
    %6 = arith.addf %3, %5 : vector<32x512xf32>
    %cst_5 = arith.constant 0.000000e+00 : f32
    %7 = vector.broadcast %cst_5 : f32 to vector<32x512xf32>
    %8 = arith.maximumf %6, %7 : vector<32x512xf32>
    %9 = arith.truncf %8 : vector<32x512xf32> to vector<32x512xbf16>
    %c0_6 = arith.constant 0 : index
    %c0_7 = arith.constant 0 : index
    %10 = vector.load %arg4[%c0_6, %c0_7] : memref<512x256xbf16, #tpu.memory_space<vmem>>, vector<512x256xbf16>
    %cst_8 = arith.constant dense<0.000000e+00> : vector<32x256xf32>
    %11 = tpu.matmul %9, %10, %cst_8 {dimension_numbers = #tpu.dot_dimension_numbers<[1], [0], [0], [1], [0, 0, 1, 1], [], []>} : vector<32x512xbf16>, vector<512x256xbf16>, vector<32x256xf32> -> vector<32x256xf32>
    %12 = arith.addf %0, %11 : vector<32x256xf32>
    %c0_9 = arith.constant 0 : index
    %c0_10 = arith.constant 0 : index
    %13 = vector.load %arg5[%c0_9, %c0_10] : memref<1x256xf32, #tpu.memory_space<vmem>>, vector<1x256xf32>
    %14 = vector.broadcast %13 : vector<1x256xf32> to vector<32x256xf32>
    %15 = arith.addf %12, %14 : vector<32x256xf32>
    %cst_11 = arith.constant dense<0.000000e+00> : vector<32xf32>
    %16 = vector.multi_reduction <add>, %15, %cst_11 [1] : vector<32x256xf32> to vector<32xf32>
    %17 = vector.shape_cast %16 : vector<32xf32> to vector<32x1xf32>
    %cst_12 = arith.constant 2.560000e+02 : f32
    %18 = vector.broadcast %cst_12 : f32 to vector<32x1xf32>
    %19 = arith.divf %17, %18 : vector<32x1xf32>
    %20 = vector.broadcast %19 : vector<32x1xf32> to vector<32x256xf32>
    %21 = arith.subf %15, %20 : vector<32x256xf32>
    %22 = arith.mulf %21, %21 : vector<32x256xf32>
    %cst_13 = arith.constant dense<0.000000e+00> : vector<32xf32>
    %23 = vector.multi_reduction <add>, %22, %cst_13 [1] : vector<32x256xf32> to vector<32xf32>
    %24 = vector.shape_cast %23 : vector<32xf32> to vector<32x1xf32>
    %cst_14 = arith.constant 2.560000e+02 : f32
    %25 = vector.broadcast %cst_14 : f32 to vector<32x1xf32>
    %26 = arith.divf %24, %25 : vector<32x1xf32>
    %cst_15 = arith.constant 9.99999974E-6 : f32
    %27 = vector.broadcast %cst_15 : f32 to vector<32x1xf32>
    %28 = arith.addf %26, %27 : vector<32x1xf32>
    %29 = math.rsqrt %28 : vector<32x1xf32>
    %30 = vector.broadcast %29 : vector<32x1xf32> to vector<32x256xf32>
    %31 = arith.mulf %21, %30 : vector<32x256xf32>
    %c0_16 = arith.constant 0 : index
    %c0_17 = arith.constant 0 : index
    %32 = vector.load %arg6[%c0_16, %c0_17] : memref<1x256xf32, #tpu.memory_space<vmem>>, vector<1x256xf32>
    %33 = vector.broadcast %32 : vector<1x256xf32> to vector<32x256xf32>
    %34 = arith.mulf %31, %33 : vector<32x256xf32>
    %c0_18 = arith.constant 0 : index
    %c0_19 = arith.constant 0 : index
    %35 = vector.load %arg7[%c0_18, %c0_19] : memref<1x256xf32, #tpu.memory_space<vmem>>, vector<1x256xf32>
    %36 = vector.broadcast %35 : vector<1x256xf32> to vector<32x256xf32>
    %37 = arith.addf %34, %36 : vector<32x256xf32>
    %c0_20 = arith.constant 0 : index
    %c0_21 = arith.constant 0 : index
    %38 = vector.load %arg8[%c0_20, %c0_21] : memref<32x256xf32, #tpu.memory_space<vmem>>, vector<32x256xf32>
    tpu.vector_store %arg8[%c0_20, %c0_21], %37 {strides = array<i32>} : memref<32x256xf32, #tpu.memory_space<vmem>>, vector<32x256xf32>,
    return
  }
  func.func @transform_0(%arg0: i32) -> (i32, i32) {
    %c0_i32 = arith.constant 0 : i32
    %c0_i32_0 = arith.constant 0 : i32
    return %arg0, %c0_i32 : i32, i32
  }
  func.func @transform_1(%arg0: i32) -> (i32, i32) {
    %c0_i32 = arith.constant 0 : i32
    %c0_i32_0 = arith.constant 0 : i32
    %c0_i32_1 = arith.constant 0 : i32
    return %c0_i32, %c0_i32_0 : i32, i32
  }
  func.func @transform_2(%arg0: i32) -> (i32, i32) {
    %c0_i32 = arith.constant 0 : i32
    %c0_i32_0 = arith.constant 0 : i32
    %c0_i32_1 = arith.constant 0 : i32
    return %c0_i32, %c0_i32_0 : i32, i32
  }
  func.func @transform_3(%arg0: i32) -> (i32, i32) {
    %c0_i32 = arith.constant 0 : i32
    %c0_i32_0 = arith.constant 0 : i32
    %c0_i32_1 = arith.constant 0 : i32
    return %c0_i32, %c0_i32_0 : i32, i32
  }
  func.func @transform_4(%arg0: i32) -> (i32, i32) {
    %c0_i32 = arith.constant 0 : i32
    %c0_i32_0 = arith.constant 0 : i32
    %c0_i32_1 = arith.constant 0 : i32
    return %c0_i32, %c0_i32_0 : i32, i32
  }
  func.func @transform_5(%arg0: i32) -> (i32, i32) {
    %c0_i32 = arith.constant 0 : i32
    %c0_i32_0 = arith.constant 0 : i32
    %c0_i32_1 = arith.constant 0 : i32
    return %c0_i32, %c0_i32_0 : i32, i32
  }
  func.func @transform_6(%arg0: i32) -> (i32, i32) {
    %c0_i32 = arith.constant 0 : i32
    %c0_i32_0 = arith.constant 0 : i32
    %c0_i32_1 = arith.constant 0 : i32
    return %c0_i32, %c0_i32_0 : i32, i32
  }
  func.func @transform_7(%arg0: i32) -> (i32, i32) {
    %c0_i32 = arith.constant 0 : i32
    %c0_i32_0 = arith.constant 0 : i32
    return %arg0, %c0_i32 : i32, i32
  }
}

module attributes {stable_mosaic.version = 11 : i64} {
  func.func @_gemm_res_ln_kernel(%arg0: i32, %arg1: memref<32x256xf32, #tpu.memory_space<vmem>>, %arg2: memref<256x256xbf16, #tpu.memory_space<vmem>>, %arg3: memref<1x256xf32, #tpu.memory_space<vmem>>, %arg4: memref<32x256xf32, #tpu.memory_space<vmem>>, %arg5: memref<1x256xf32, #tpu.memory_space<vmem>>, %arg6: memref<1x256xf32, #tpu.memory_space<vmem>>, %arg7: memref<32x256xf32, #tpu.memory_space<vmem>>) attributes {dimension_semantics = [#tpu.dimension_semantics<parallel>], iteration_bounds = array<i64: 1>, scalar_prefetch = 0 : i64, scratch_operands = 0 : i64, tpu.core_type = #tpu.core_type<tc>, window_params = [{transform_indices = @transform_0, window_bounds = array<i64: 32, 256>}, {pipeline_mode = #tpu.pipeline_mode<synchronous>, transform_indices = @transform_1, window_bounds = array<i64: 256, 256>}, {pipeline_mode = #tpu.pipeline_mode<synchronous>, transform_indices = @transform_2, window_bounds = array<i64: 1, 256>}, {transform_indices = @transform_3, window_bounds = array<i64: 32, 256>}, {pipeline_mode = #tpu.pipeline_mode<synchronous>, transform_indices = @transform_4, window_bounds = array<i64: 1, 256>}, {pipeline_mode = #tpu.pipeline_mode<synchronous>, transform_indices = @transform_5, window_bounds = array<i64: 1, 256>}, {transform_indices = @transform_6, window_bounds = array<i64: 32, 256>}]} {
    %c0 = arith.constant 0 : index
    %c0_0 = arith.constant 0 : index
    %0 = vector.load %arg1[%c0, %c0_0] : memref<32x256xf32, #tpu.memory_space<vmem>>, vector<32x256xf32>
    %1 = arith.truncf %0 : vector<32x256xf32> to vector<32x256xbf16>
    %c0_1 = arith.constant 0 : index
    %c0_2 = arith.constant 0 : index
    %2 = vector.load %arg2[%c0_1, %c0_2] : memref<256x256xbf16, #tpu.memory_space<vmem>>, vector<256x256xbf16>
    %cst = arith.constant dense<0.000000e+00> : vector<32x256xf32>
    %3 = tpu.matmul %1, %2, %cst {dimension_numbers = #tpu.dot_dimension_numbers<[1], [0], [0], [1], [0, 0, 1, 1], [], []>} : vector<32x256xbf16>, vector<256x256xbf16>, vector<32x256xf32> -> vector<32x256xf32>
    %c0_3 = arith.constant 0 : index
    %c0_4 = arith.constant 0 : index
    %4 = vector.load %arg4[%c0_3, %c0_4] : memref<32x256xf32, #tpu.memory_space<vmem>>, vector<32x256xf32>
    %5 = arith.addf %4, %3 : vector<32x256xf32>
    %c0_5 = arith.constant 0 : index
    %c0_6 = arith.constant 0 : index
    %6 = vector.load %arg3[%c0_5, %c0_6] : memref<1x256xf32, #tpu.memory_space<vmem>>, vector<1x256xf32>
    %7 = vector.broadcast %6 : vector<1x256xf32> to vector<32x256xf32>
    %8 = arith.addf %5, %7 : vector<32x256xf32>
    %cst_7 = arith.constant dense<0.000000e+00> : vector<32xf32>
    %9 = vector.multi_reduction <add>, %8, %cst_7 [1] : vector<32x256xf32> to vector<32xf32>
    %10 = vector.shape_cast %9 : vector<32xf32> to vector<32x1xf32>
    %cst_8 = arith.constant 2.560000e+02 : f32
    %11 = vector.broadcast %cst_8 : f32 to vector<32x1xf32>
    %12 = arith.divf %10, %11 : vector<32x1xf32>
    %13 = vector.broadcast %12 : vector<32x1xf32> to vector<32x256xf32>
    %14 = arith.subf %8, %13 : vector<32x256xf32>
    %15 = arith.mulf %14, %14 : vector<32x256xf32>
    %cst_9 = arith.constant dense<0.000000e+00> : vector<32xf32>
    %16 = vector.multi_reduction <add>, %15, %cst_9 [1] : vector<32x256xf32> to vector<32xf32>
    %17 = vector.shape_cast %16 : vector<32xf32> to vector<32x1xf32>
    %cst_10 = arith.constant 2.560000e+02 : f32
    %18 = vector.broadcast %cst_10 : f32 to vector<32x1xf32>
    %19 = arith.divf %17, %18 : vector<32x1xf32>
    %cst_11 = arith.constant 9.99999974E-6 : f32
    %20 = vector.broadcast %cst_11 : f32 to vector<32x1xf32>
    %21 = arith.addf %19, %20 : vector<32x1xf32>
    %22 = math.rsqrt %21 : vector<32x1xf32>
    %23 = vector.broadcast %22 : vector<32x1xf32> to vector<32x256xf32>
    %24 = arith.mulf %14, %23 : vector<32x256xf32>
    %c0_12 = arith.constant 0 : index
    %c0_13 = arith.constant 0 : index
    %25 = vector.load %arg5[%c0_12, %c0_13] : memref<1x256xf32, #tpu.memory_space<vmem>>, vector<1x256xf32>
    %26 = vector.broadcast %25 : vector<1x256xf32> to vector<32x256xf32>
    %27 = arith.mulf %24, %26 : vector<32x256xf32>
    %c0_14 = arith.constant 0 : index
    %c0_15 = arith.constant 0 : index
    %28 = vector.load %arg6[%c0_14, %c0_15] : memref<1x256xf32, #tpu.memory_space<vmem>>, vector<1x256xf32>
    %29 = vector.broadcast %28 : vector<1x256xf32> to vector<32x256xf32>
    %30 = arith.addf %27, %29 : vector<32x256xf32>
    %c0_16 = arith.constant 0 : index
    %c0_17 = arith.constant 0 : index
    %31 = vector.load %arg7[%c0_16, %c0_17] : memref<32x256xf32, #tpu.memory_space<vmem>>, vector<32x256xf32>
    tpu.vector_store %arg7[%c0_16, %c0_17], %30 {strides = array<i32>} : memref<32x256xf32, #tpu.memory_space<vmem>>, vector<32x256xf32>,
    return
  }
  func.func @transform_0(%arg0: i32) -> (i32, i32) {
    %c0_i32 = arith.constant 0 : i32
    %c0_i32_0 = arith.constant 0 : i32
    return %arg0, %c0_i32 : i32, i32
  }
  func.func @transform_1(%arg0: i32) -> (i32, i32) {
    %c0_i32 = arith.constant 0 : i32
    %c0_i32_0 = arith.constant 0 : i32
    %c0_i32_1 = arith.constant 0 : i32
    return %c0_i32, %c0_i32_0 : i32, i32
  }
  func.func @transform_2(%arg0: i32) -> (i32, i32) {
    %c0_i32 = arith.constant 0 : i32
    %c0_i32_0 = arith.constant 0 : i32
    %c0_i32_1 = arith.constant 0 : i32
    return %c0_i32, %c0_i32_0 : i32, i32
  }
  func.func @transform_3(%arg0: i32) -> (i32, i32) {
    %c0_i32 = arith.constant 0 : i32
    %c0_i32_0 = arith.constant 0 : i32
    return %arg0, %c0_i32 : i32, i32
  }
  func.func @transform_4(%arg0: i32) -> (i32, i32) {
    %c0_i32 = arith.constant 0 : i32
    %c0_i32_0 = arith.constant 0 : i32
    %c0_i32_1 = arith.constant 0 : i32
    return %c0_i32, %c0_i32_0 : i32, i32
  }
  func.func @transform_5(%arg0: i32) -> (i32, i32) {
    %c0_i32 = arith.constant 0 : i32
    %c0_i32_0 = arith.constant 0 : i32
    %c0_i32_1 = arith.constant 0 : i32
    return %c0_i32, %c0_i32_0 : i32, i32
  }
  func.func @transform_6(%arg0: i32) -> (i32, i32) {
    %c0_i32 = arith.constant 0 : i32
    %c0_i32_0 = arith.constant 0 : i32
    return %arg0, %c0_i32 : i32, i32
  }
}

</mosaic_0001>

<bundles_post_ra>
// kernel: transformer_encoder_layer.3
= control target key start
LH: loop header
LB: loop body
LE: loop exit
PB: predicated region body
PF: predicated region fallthrough
CT: control target
= control target key end

     0   :  { %8 = vsyncpa [#allocation4], 0  ;;  %s1608_s0 = inlined_call_operand.vmem [shape: f32[32,256], index: 0, kind: input, shape index: {}]   ;;  %s1609_s1 = inlined_call_operand.hbm [shape: bf16[256,768], index: 1, kind: input, shape index: {}]   ;;  %s1610_s2 = inlined_call_operand.vmem [shape: f32[1,768], index: 2, kind: input, shape index: {}]   ;;  %s1611_s3 = inlined_call_operand.vmem [shape: bf16[32,768], index: 3, kind: output, shape index: {}]  }
   0x1   :  { %10 = vsyncpa [#allocation4 + $0x1], 0  ;;  %s1356_s12 = smov 0   ;;  %s1358_s13 = smov 0  }
   0x2   :  { %s1360_s14 = smov 0   ;;  %s1362_s15 = smov 0  }
   0x3   :  { %s1364_s16 = smov 0   ;;  %s1366_s17 = smov 0  }
   0x4 LB: > { %s914_s18 = sadd.s32 4294967295, %s1331_s17   ;;  %s31_s19 = sadd.s32 1, %s1327_s16  ;;  %s1331_s17 = sphi %s1366_s17, %s16_s17   ;;  %s1327_s16 = sphi %s1364_s16, %s1619_s16   ;;  %s1323_s15 = sphi %s1362_s15, %s1618_s15   ;;  %s1319_s14 = sphi %s1360_s14, %s1617_s14   ;;  %s1315_s13 = sphi %s1358_s13, %s1616_s13   ;;  %s1311_s12 = sphi %s1356_s12, %s1615_s12  }
   0x5   : > { %p33_p0 = scmp.ge.s32.totalorder %s31_s19, 2  ;;  %s72_s20 = sadd.s32 1, %s1319_s14 }
   0x6   : > { %p79_p1 = scmp.ne.s32.totalorder %s1319_s14, %s1315_s13  ;;  %p80_p2 = scmp.eq.s32.totalorder %s1331_s17, 0 }
   0x7   : > { %s1621_s19 = smov (%p33_p0, %s31_s19), 0  ;;  %p85_p4 = scmp.ne.s32.totalorder %s1315_s13, %s1311_s12 }
   0x8   : > { %p1392_p3 = por %p80_p2, %p79_p1  ;;  %s68_s22 = ssub.s32 %s1327_s16, %s1621_s19 }
   0x9   : > { %p86_p5 = scmp.eq.s32.totalorder %s914_s18, 0  ;;  %p70_p6 = scmp.eq.s32.totalorder %s68_s22, 0 }
   0xa   : > { %p137_p7 = scmp.eq.s32.totalorder %s914_s18, 1  ;;  %p1199_p10 = scmp.lt.s32.totalorder %s1331_s17, 2 }
   0xb   : > { %p1399_p8 = por %p86_p5, %p85_p4  ;;  %s178_s26 = sand.u32 1, %s1319_s14  }
   0xc   : > { %s1404_s24 = scalar_select %p70_p6, %s1319_s14, %s72_s20  }
   0xd   : > { %p1406_p9 = por %p137_p7, %p79_p1  ;;  %s1124_s27 = smul.u32 12, %s1327_s16 }
   0xe   : > { %s1190_s28 = smul.u32 384, %s178_s26  ;;  %p1196_p11 = pnand %p1199_p10, %p1392_p3 }
   0xf   : > { %s190_s4 = scalar_lea.hbm %s1609_s1, %s1124_s27  ;;  %p920_p12 = scmp.ge.s32.totalorder %s1331_s17, 1 }
  0x10   : > { %s191_s5 = sshll.u32 %s190_s4, 4  ;;  %s182_s6 = scalar_lea.vmem [#allocation3], %s1190_s28  ;;  %s192_s5 = int_to_ptr.hbm [resolvable:$true] %s191_s5 }
  0x11   : > { %s193_s7 = sshll.u32 %s182_s6, 4  ;;  %s179_s8 = scalar_lea.sflag [#allocation4], %s178_s26  ;;  %s194_s7 = int_to_ptr.vmem [resolvable:$true] %s193_s7 }
  0x12   : > { %s1333_s9 = smov 384   ;;  %s1334_s10 = smov 192  }
  0x13   : > { %s1335_s11 = smov 12   ;;  %p209_p13 = scmp.lt.s32.totalorder %s1331_s17, 3 }
  0x14   : > { %1198 = dma.hbm_to_vmem [thread:$0]  (!%p1196_p11), %s192_s5, 6144, %s194_s7, %s179_s8, %s1333_s9, %s1334_s10, %s1335_s11  }
  0x15   : > { %p210_p0 = pnand %p920_p12, %p209_p13 }
  0x16   : > { %s1421_s12 = sand.u32 (!%p210_p0), 1, %s1315_s13  }
  0x17   : > { %213 = sbr.rel (%p210_p0) target bundleno = 252 (0xfc), region = 32  ;;  %s216_s20 = scalar_lea.sflag (!%p210_p0), [#allocation4], %s1421_s12 }
  0x18   : > { %s1191_s18 = smul.u32 (!%p210_p0), 384, %s1421_s12 }
  0x1a   : > { %s1425_s21 = scalar_lea.vmem (!%p210_p0), [#allocation3], %s1191_s18 }
  0x1c   : > { %1306 = dma.done.wait (%p1399_p8), %s216_s20, 6144  }
  0x1d   : > { %1308 = vsyncadd (%p1399_p8), %s216_s20, 4294961152  ;;  %v1007_v0 = vld [vmem:[%s1425_s21 + $0xa8] sm:$0xf]  ;;  %v1147_v1 = vld [vmem:[%s1425_s21 + $0xb0] sm:$0xf0]  ;;  %s270_s20 = smul.u32 3, %s1323_s15 }
  0x1e   : > { %v1103_v2 = vld [vmem:[%s1425_s21 + $0x168] sm:$0xf]  ;;  %v1008_v3 = vor.u32 %v1147_v1, %v1007_v0  ;;  %v1171_v4 = vld [vmem:[%s1425_s21 + $0x170] sm:$0xf0]  ;;  %v1146_v5 = vld [vmem:[%s1425_s21 + $0xac] sm:$0xf] }
  0x1f   : > { %v1009_v6 = vld [vmem:[%s1425_s21 + $0xb4] sm:$0xf0]  ;;  %v1104_v7 = vor.u32 %v1171_v4, %v1103_v2  ;;  %v1170_v9 = vld [vmem:[%s1425_s21 + $0x16c] sm:$0xf]  ;;  %v995_v11 = vld [vmem:[%s1425_s21 + $0x90] sm:$0xf] }
  0x20   : > { %v1012_v8 = vor.u32 %v1146_v5, %v1009_v6  ;;  %v1105_v10 = vld [vmem:[%s1425_s21 + $0x174] sm:$0xf0]  ;;  %617 = vmatpush.bf16.msra.mxu0 %v1008_v3  ;;  %v1144_v13 = vld [vmem:[%s1425_s21 + $0x98] sm:$0xf0]  ;;  %v1091_v14 = vld [vmem:[%s1425_s21 + $0x150] sm:$0xf] }
  0x21   : > { %v1108_v12 = vor.u32 %v1170_v9, %v1105_v10  ;;  %v1168_v15 = vld [vmem:[%s1425_s21 + $0x158] sm:$0xf0]  ;;  %636 = vmatpush.bf16.msra.mxu1 %v1104_v7  ;;  %v996_v16 = vor.u32 %v1144_v13, %v995_v11  ;;  %v1143_v18 = vld [vmem:[%s1425_s21 + $0x94] sm:$0xf]  ;;  %v997_v19 = vld [vmem:[%s1425_s21 + $0x9c] sm:$0xf0] }
  0x22   : > { %655 = vmatpush.bf16.msra.mxu2 %v1012_v8  ;;  %v1092_v17 = vor.u32 %v1168_v15, %v1091_v14  ;;  %v1167_v20 = vld [vmem:[%s1425_s21 + $0x154] sm:$0xf]  ;;  %v1000_v21 = vor.u32 %v1143_v18, %v997_v19  ;;  %v1093_v22 = vld [vmem:[%s1425_s21 + $0x15c] sm:$0xf0]  ;;  %v983_v23 = vld [vmem:[%s1425_s21 + $0x78] sm:$0xf] }
  0x23   : > { %674 = vmatpush.bf16.msra.mxu3 %v1108_v12  ;;  %v1141_v24 = vld [vmem:[%s1425_s21 + $0x80] sm:$0xf0]  ;;  %v1096_v25 = vor.u32 %v1167_v20, %v1093_v22  ;;  %v1079_v26 = vld [vmem:[%s1425_s21 + $0x138] sm:$0xf]  ;;  %v1140_v28 = vld [vmem:[%s1425_s21 + $0x7c] sm:$0xf] }
  0x24   : > { %v1165_v27 = vld [vmem:[%s1425_s21 + $0x140] sm:$0xf0]  ;;  %618 = vmatpush.bf16.msra.mxu0 %v996_v16  ;;  %v984_v29 = vor.u32 %v1141_v24, %v983_v23  ;;  %v985_v30 = vld [vmem:[%s1425_s21 + $0x84] sm:$0xf0]  ;;  %v1164_v31 = vld [vmem:[%s1425_s21 + $0x13c] sm:$0xf] }
  0x25   : > { %v1081_v32 = vld [vmem:[%s1425_s21 + $0x144] sm:$0xf0]  ;;  %637 = vmatpush.bf16.msra.mxu1 %v1092_v17  ;;  %v1080_v33 = vor.u32 %v1165_v27, %v1079_v26  ;;  %v988_v34 = vor.u32 %v1140_v28, %v985_v30  ;;  %v971_v35 = vld [vmem:[%s1425_s21 + $0x60] sm:$0xf]  ;;  %v1138_v36 = vld [vmem:[%s1425_s21 + $0x68] sm:$0xf0] }
  0x26   : > { %656 = vmatpush.bf16.msra.mxu2 %v1000_v21  ;;  %v1067_v37 = vld [vmem:[%s1425_s21 + $0x120] sm:$0xf]  ;;  %v1084_v38 = vor.u32 %v1164_v31, %v1081_v32  ;;  %v1162_v39 = vld [vmem:[%s1425_s21 + $0x128] sm:$0xf0]  ;;  %v1137_v40 = vld [vmem:[%s1425_s21 + $0x64] sm:$0xf]  ;;  %v972_v44 = vor.u32 %v1138_v36, %v971_v35 }
  0x27   : > { %675 = vmatpush.bf16.msra.mxu3 %v1096_v25  ;;  %v973_v41 = vld [vmem:[%s1425_s21 + $0x6c] sm:$0xf0]  ;;  %v1161_v42 = vld [vmem:[%s1425_s21 + $0x124] sm:$0xf]  ;;  %v1068_v45 = vor.u32 %v1162_v39, %v1067_v37  ;;  %v959_v47 = vld [vmem:[%s1425_s21 + $0x48] sm:$0xf] }
  0x28   : > { %v1069_v43 = vld [vmem:[%s1425_s21 + $0x12c] sm:$0xf0]  ;;  %619 = vmatpush.bf16.msra.mxu0 %v984_v29  ;;  %v976_v46 = vor.u32 %v1137_v40, %v973_v41  ;;  %v1135_v48 = vld [vmem:[%s1425_s21 + $0x50] sm:$0xf0]  ;;  %v1055_v49 = vld [vmem:[%s1425_s21 + $0x108] sm:$0xf] }
  0x29   : > { %638 = vmatpush.bf16.msra.mxu1 %v1080_v33  ;;  %v1072_v50 = vor.u32 %v1161_v42, %v1069_v43  ;;  %v1159_v51 = vld [vmem:[%s1425_s21 + $0x110] sm:$0xf0]  ;;  %v1134_v52 = vld [vmem:[%s1425_s21 + $0x4c] sm:$0xf]  ;;  %v961_v53 = vld [vmem:[%s1425_s21 + $0x54] sm:$0xf0]  ;;  %v960_v56 = vor.u32 %v1135_v48, %v959_v47 }
  0x2a   : > { %657 = vmatpush.bf16.msra.mxu2 %v988_v34  ;;  %v1158_v54 = vld [vmem:[%s1425_s21 + $0x10c] sm:$0xf]  ;;  %v1057_v55 = vld [vmem:[%s1425_s21 + $0x114] sm:$0xf0]  ;;  %v1056_v57 = vor.u32 %v1159_v51, %v1055_v49  ;;  %v964_v58 = vor.u32 %v1134_v52, %v961_v53  ;;  %v947_v59 = vld [vmem:[%s1425_s21 + $0x30] sm:$0xf] }
  0x2b   : > { %676 = vmatpush.bf16.msra.mxu3 %v1084_v38  ;;  %v1132_v60 = vld [vmem:[%s1425_s21 + $0x38] sm:$0xf0]  ;;  %v1043_v61 = vld [vmem:[%s1425_s21 + $0xf0] sm:$0xf]  ;;  %v1060_v62 = vor.u32 %v1158_v54, %v1057_v55  ;;  %v1131_v0 = vld [vmem:[%s1425_s21 + $0x34] sm:$0xf] }
  0x2c   : > { %620 = vmatpush.bf16.msra.mxu0 %v972_v44  ;;  %v1156_v63 = vld [vmem:[%s1425_s21 + $0xf8] sm:$0xf0]  ;;  %v949_v1 = vld [vmem:[%s1425_s21 + $0x3c] sm:$0xf0]  ;;  %v1155_v2 = vld [vmem:[%s1425_s21 + $0xf4] sm:$0xf]  ;;  %v948_v4 = vor.u32 %v1132_v60, %v947_v59 }
  0x2d   : > { %639 = vmatpush.bf16.msra.mxu1 %v1068_v45  ;;  %v1045_v3 = vld [vmem:[%s1425_s21 + $0xfc] sm:$0xf0]  ;;  %v1044_v5 = vor.u32 %v1156_v63, %v1043_v61  ;;  %v952_v6 = vor.u32 %v1131_v0, %v949_v1  ;;  %v935_v7 = vld [vmem:[%s1425_s21 + $0x18] sm:$0xf]  ;;  %v1129_v8 = vld [vmem:[%s1425_s21 + $0x20] sm:$0xf0] }
  0x2e   : > { %658 = vmatpush.bf16.msra.mxu2 %v976_v46  ;;  %v1031_v9 = vld [vmem:[%s1425_s21 + $0xd8] sm:$0xf]  ;;  %v1048_v10 = vor.u32 %v1155_v2, %v1045_v3  ;;  %v1153_v11 = vld [vmem:[%s1425_s21 + $0xe0] sm:$0xf0]  ;;  %v1128_v12 = vld [vmem:[%s1425_s21 + $0x1c] sm:$0xf]  ;;  %v936_v16 = vor.u32 %v1129_v8, %v935_v7 }
  0x2f   : > { %677 = vmatpush.bf16.msra.mxu3 %v1072_v50  ;;  %v937_v13 = vld [vmem:[%s1425_s21 + $0x24] sm:$0xf0]  ;;  %v1152_v14 = vld [vmem:[%s1425_s21 + $0xdc] sm:$0xf]  ;;  %v923_v17 = vld [vmem:[%s1425_s21] sm:$0xf]  ;;  %v1032_v19 = vor.u32 %v1153_v11, %v1031_v9 }
  0x30   : > { %621 = vmatpush.bf16.msra.mxu0 %v960_v56  ;;  %v1033_v15 = vld [vmem:[%s1425_s21 + $0xe4] sm:$0xf0]  ;;  %v1126_v18 = vld [vmem:[%s1425_s21 + $0x8] sm:$0xf0]  ;;  %v940_v20 = vor.u32 %v1128_v12, %v937_v13  ;;  %v1019_v21 = vld [vmem:[%s1425_s21 + $0xc0] sm:$0xf] }
  0x31   : > { %640 = vmatpush.bf16.msra.mxu1 %v1056_v57  ;;  %v1150_v22 = vld [vmem:[%s1425_s21 + $0xc8] sm:$0xf0]  ;;  %v1125_v23 = vld [vmem:[%s1425_s21 + $0x4] sm:$0xf]  ;;  %v1036_v24 = vor.u32 %v1152_v14, %v1033_v15  ;;  %v925_v25 = vld [vmem:[%s1425_s21 + $0xc] sm:$0xf0]  ;;  %v924_v31 = vor.u32 %v1126_v18, %v923_v17 }
  0x32   : > { %659 = vmatpush.bf16.msra.mxu2 %v964_v58  ;;  %v1149_v26 = vld [vmem:[%s1425_s21 + $0xc4] sm:$0xf]  ;;  %v1021_v27 = vld [vmem:[%s1425_s21 + $0xcc] sm:$0xf0]  ;;  %v1148_v30 = vld [vmem:[%s1425_s21 + $0xb8] sm:$0xf0]  ;;  %v1020_v35 = vor.u32 %v1150_v22, %v1019_v21  ;;  %v928_v36 = vor.u32 %v1125_v23, %v925_v25 }
  0x33   : > { %678 = vmatpush.bf16.msra.mxu3 %v1060_v62  ;;  %v277_v28 = vld [vmem:[%s1608_s0] sm:$0xff]  ;;  %v1015_v29 = vld [vmem:[%s1425_s21 + $0xb0] sm:$0xf]  ;;  %v1172_v34 = vld [vmem:[%s1425_s21 + $0x178] sm:$0xf0]  ;;  %v1024_v39 = vor.u32 %v1149_v26, %v1021_v27  ;;  %p271_p1 = scmp.lt.s32.totalorder %s270_s20, 5 }
  0x34   : > { %622 = vmatpush.bf16.msra.mxu0 %v948_v4  ;;  %v279_v32 = vld [vmem:[%s1608_s0 + $0x10] sm:$0xff]  ;;  %v278_v37 = vld [vmem:[%s1608_s0 + $0x8] sm:$0xff]  ;;  %v280_v38 = vld [vmem:[%s1608_s0 + $0x18] sm:$0xff]  ;;  %v1016_v40 = vor.u32 %v1148_v30, %v1015_v29  ;;  %s1192_s26 = smul.u32 48, %s1421_s12 }
  0x35   : > { %641 = vmatpush.bf16.msra.mxu1 %v1044_v5  ;;  %v1111_v33 = vld [vmem:[%s1425_s21 + $0x170] sm:$0xf]  ;;  %v1511_v41 = vpack.c.bf16 %v279_v32, %v277_v28  ;;  %v1003_v43 = vld [vmem:[%s1425_s21 + $0x98] sm:$0xf]  ;;  %v1145_v44 = vld [vmem:[%s1425_s21 + $0xa0] sm:$0xf0]  ;;  %v1515_v45 = vpack.c.bf16 %v280_v38, %v278_v37 }
  0x36   : > { %660 = vmatpush.bf16.msra.mxu2 %v952_v6  ;;  %v1112_v42 = vor.u32 %v1172_v34, %v1111_v33  ;;  %v1099_v46 = vld [vmem:[%s1425_s21 + $0x158] sm:$0xf]  ;;  %v1169_v47 = vld [vmem:[%s1425_s21 + $0x160] sm:$0xf0]  ;;  %v1004_v48 = vor.u32 %v1145_v44, %v1003_v43  ;;  %v991_v50 = vld [vmem:[%s1425_s21 + $0x80] sm:$0xf] }
  0x37   : > { %679 = vmatpush.bf16.msra.mxu3 %v1048_v10  ;;  %v1100_v49 = vor.u32 %v1169_v47, %v1099_v46  ;;  %v1142_v51 = vld [vmem:[%s1425_s21 + $0x88] sm:$0xf0]  ;;  %v1087_v52 = vld [vmem:[%s1425_s21 + $0x140] sm:$0xf]  ;;  %v979_v56 = vld [vmem:[%s1425_s21 + $0x68] sm:$0xf] }
  0x38   : > { %623 = vmatpush.bf16.msra.mxu0 %v936_v16  ;;  %v1166_v53 = vld [vmem:[%s1425_s21 + $0x148] sm:$0xf0]  ;;  %v992_v54 = vor.u32 %v1142_v51, %v991_v50  ;;  %v1139_v57 = vld [vmem:[%s1425_s21 + $0x70] sm:$0xf0]  ;;  %v1075_v58 = vld [vmem:[%s1425_s21 + $0x128] sm:$0xf] }
  0x39   : > { %642 = vmatpush.bf16.msra.mxu1 %v1032_v19  ;;  %v1088_v55 = vor.u32 %v1166_v53, %v1087_v52  ;;  %v1163_v59 = vld [vmem:[%s1425_s21 + $0x130] sm:$0xf0]  ;;  %v980_v60 = vor.u32 %v1139_v57, %v979_v56  ;;  %v281_v62 = vld [vmem:[%s1608_s0 + $0x20] sm:$0xff]  ;;  %v967_v63 = vld [vmem:[%s1425_s21 + $0x50] sm:$0xf]  ;;  %s1623_s20 = smov (!%p271_p1, %s270_s20), 5 }
  0x3a   : > { %661 = vmatpush.bf16.msra.mxu2 %v940_v20  ;;  %v1076_v61 = vor.u32 %v1163_v59, %v1075_v58  ;;  %v1136_v0 = vld [vmem:[%s1425_s21 + $0x58] sm:$0xf0]  ;;  %v283_v1 = vld [vmem:[%s1608_s0 + $0x30] sm:$0xff]  ;;  %v282_v4 = vld [vmem:[%s1608_s0 + $0x28] sm:$0xff]  ;;  %s273_s23 = scalar_lea.vmem %s1610_s2, %s1623_s20  ;;  %s1566_s27 = scalar_lea.vmem [#allocation5], %s1192_s26 }
  0x3b   : > { %680 = vmatpush.bf16.msra.mxu3 %v1036_v24  ;;  %v1063_v2 = vld [vmem:[%s1425_s21 + $0x110] sm:$0xf]  ;;  %v1160_v3 = vld [vmem:[%s1425_s21 + $0x118] sm:$0xf0]  ;;  %v968_v6 = vor.u32 %v1136_v0, %v967_v63  ;;  %v287_v7 = vpack.c.bf16 %v283_v1, %v281_v62  ;;  %v955_v9 = vld [vmem:[%s1425_s21 + $0x38] sm:$0xf] }
  0x3c   : > { %624 = vmatpush.bf16.msra.mxu0 %v924_v31  ;;  %v284_v5 = vld [vmem:[%s1608_s0 + $0x38] sm:$0xff]  ;;  %v1064_v8 = vor.u32 %v1160_v3, %v1063_v2  ;;  %v1133_v10 = vld [vmem:[%s1425_s21 + $0x40] sm:$0xf0]  ;;  %v943_v16 = vld [vmem:[%s1425_s21 + $0x20] sm:$0xf]  ;;  %s1173_s12 = smul.u32 (%p1406_p9), 12, %s1323_s15 }
  0x3d   : > { %643 = vmatpush.bf16.msra.mxu1 %v1020_v35  ;;  %v288_v11 = vpack.c.bf16 %v284_v5, %v282_v4  ;;  %v1051_v12 = vld [vmem:[%s1425_s21 + $0xf8] sm:$0xf]  ;;  %v1157_v13 = vld [vmem:[%s1425_s21 + $0x100] sm:$0xf0]  ;;  %v956_v14 = vor.u32 %v1133_v10, %v955_v9  ;;  %v1130_v17 = vld [vmem:[%s1425_s21 + $0x28] sm:$0xf0] }
  0x3e   : > { %662 = vmatpush.bf16.msra.mxu2 %v928_v36  ;;  %v1052_v15 = vor.u32 %v1157_v13, %v1051_v12  ;;  %v1039_v18 = vld [vmem:[%s1425_s21 + $0xe0] sm:$0xf]  ;;  %v1154_v19 = vld [vmem:[%s1425_s21 + $0xe8] sm:$0xf0]  ;;  %v944_v20 = vor.u32 %v1130_v17, %v943_v16  ;;  %v931_v22 = vld [vmem:[%s1425_s21 + $0x8] sm:$0xf]  ;;  %s759_s30 = scalar_lea.vmem (%p1406_p9), %s1611_s3, %s1173_s12 }
  0x3f   : > { %681 = vmatpush.bf16.msra.mxu3 %v1024_v39  ;;  %625 = vmatmul.bf16.vlgmr.msra.gmra.mxu0 %v1511_v41  ;;  %v1040_v21 = vor.u32 %v1154_v19, %v1039_v18  ;;  %v1127_v23 = vld [vmem:[%s1425_s21 + $0x10] sm:$0xf0]  ;;  %v1027_v24 = vld [vmem:[%s1425_s21 + $0xc8] sm:$0xf]  ;;  %v353_v28 = vld [vmem:[%s273_s23] sm:$0x7] }
  0x40   : > { %644 = vmatmul.bf16.vlgmr.msra.gmra.mxu1 %v1515_v45  ;;  %693 = vmatpush.bf16.msrb.mxu0 %v1016_v40  ;;  %v1151_v25 = vld [vmem:[%s1425_s21 + $0xd0] sm:$0xf0]  ;;  %v932_v26 = vor.u32 %v1127_v23, %v931_v22  ;;  %v355_v29 = vperm.slane %v353_v28, 0  ;;  %v356_v33 = vperm.slane %v353_v28, 1 }
  0x41   : > { %712 = vmatpush.bf16.msrb.mxu1 %v1112_v42  ;;  %663 = vmatmul.bf16.vlgmr.msra.gmra.mxu2 %v1511_v41  ;;  %v1028_v27 = vor.u32 %v1151_v25, %v1027_v24 }
  0x42   : > { %1174 = vmatpush.bf16.msrb.mxu2 %v1016_v40  ;;  %682 = vmatmul.bf16.vlgmr.msra.gmra.mxu3 %v1515_v45 }
  0x43   : > { %1182 = vmatpush.bf16.msrb.mxu3 %v1112_v42 }
  0x44   : > { %694 = vmatpush.bf16.msrb.mxu0 %v1004_v48 }
  0x45   : > { %713 = vmatpush.bf16.msrb.mxu1 %v1100_v49 }
  0x46   : > { %1175 = vmatpush.bf16.msrb.mxu2 %v1004_v48 }
  0x47   : > { %1183 = vmatpush.bf16.msrb.mxu3 %v1100_v49 }
  0x48   : > { %695 = vmatpush.bf16.msrb.mxu0 %v992_v54 }
  0x49   : > { %714 = vmatpush.bf16.msrb.mxu1 %v1088_v55 }
  0x4a   : > { %1176 = vmatpush.bf16.msrb.mxu2 %v992_v54 }
  0x4b   : > { %1184 = vmatpush.bf16.msrb.mxu3 %v1088_v55 }
  0x4c   : > { %696 = vmatpush.bf16.msrb.mxu0 %v980_v60 }
  0x4d   : > { %715 = vmatpush.bf16.msrb.mxu1 %v1076_v61 }
  0x4e   : > { %1177 = vmatpush.bf16.msrb.mxu2 %v980_v60 }
  0x4f   : > { %1185 = vmatpush.bf16.msrb.mxu3 %v1076_v61  ;;  %630 = vmatmul.bf16.gmra.mxu0 %v287_v7  ;;  %v357_v61 = vperm.slane %v353_v28, 2 }
  0x50   : > { %649 = vmatmul.bf16.gmra.mxu1 %v288_v11  ;;  %697 = vmatpush.bf16.msrb.mxu0 %v968_v6 }
  0x51   : > { %716 = vmatpush.bf16.msrb.mxu1 %v1064_v8  ;;  %668 = vmatmul.bf16.gmra.mxu2 %v287_v7 }
  0x52   : > { %1178 = vmatpush.bf16.msrb.mxu2 %v968_v6  ;;  %687 = vmatmul.bf16.gmra.mxu3 %v288_v11 }
  0x53   : > { %1186 = vmatpush.bf16.msrb.mxu3 %v1064_v8 }
  0x54   : > { %698 = vmatpush.bf16.msrb.mxu0 %v956_v14 }
  0x55   : > { %717 = vmatpush.bf16.msrb.mxu1 %v1052_v15 }
  0x56   : > { %1179 = vmatpush.bf16.msrb.mxu2 %v956_v14 }
  0x57   : > { %1187 = vmatpush.bf16.msrb.mxu3 %v1052_v15 }
  0x58   : > { %699 = vmatpush.bf16.msrb.mxu0 %v944_v20 }
  0x59   : > { %718 = vmatpush.bf16.msrb.mxu1 %v1040_v21 }
  0x5a   : > { %1180 = vmatpush.bf16.msrb.mxu2 %v944_v20 }
  0x5b   : > { %1188 = vmatpush.bf16.msrb.mxu3 %v1040_v21 }
  0x5c   : > { %700 = vmatpush.bf16.msrb.mxu0 %v932_v26 }
  0x5d   : > { %719 = vmatpush.bf16.msrb.mxu1 %v1028_v27 }
  0x5e   : > { %1181 = vmatpush.bf16.msrb.mxu2 %v932_v26 }
  0x5f   : > { %1189 = vmatpush.bf16.msrb.mxu3 %v1028_v27  ;;  %701 = vmatmul.bf16.vlgmr.msrb.gmra.mxu0 %v1511_v41 }
  0x60   : > { %720 = vmatmul.bf16.vlgmr.msrb.gmra.mxu1 %v1515_v45 }
  0x61   : > { %706 = vmatmul.bf16.vlgmr.msrb.gmra.mxu2 %v287_v7 }
  0x62   : > { %725 = vmatmul.bf16.vlgmr.msrb.gmra.mxu3 %v288_v11 }
  0xbc   : > { %v626_v30 = vpop.f32.mrf.mxu0 }
  0xbd   : > { %v645_v31 = vpop.f32.mrf.mxu1  ;;  %v627_v32 = vadd.f32 %v626_v30, %v355_v29 }
  0xbf   : > { %v646_v35 = vadd.f32 %v645_v31, %v627_v32 }
  0xc4   : > { %v664_v34 = vpop.f32.mrf.mxu2  ;;  %v628_v38 = vpop.f32.mrf.mxu0 }
  0xc5   : > { %v665_v36 = vadd.f32 %v664_v34, %v356_v33  ;;  %v683_v37 = vpop.f32.mrf.mxu3  ;;  %v647_v39 = vpop.f32.mrf.mxu1  ;;  %v629_v42 = vadd.f32 %v628_v38, %v355_v29 }
  0xc7   : > { %v684_v40 = vadd.f32 %v683_v37, %v665_v36  ;;  %v648_v48 = vadd.f32 %v647_v39, %v629_v42 }
  0xc9   : > { %v731_v41 = vpack.c.bf16 %v684_v40, %v646_v35 }
  0xcb   : > { %739 = vst [vmem:[%s1566_s27] sm:$0xff] %v731_v41 }
  0xcc   : > { %v666_v43 = vpop.f32.mrf.mxu2  ;;  %v631_v46 = vpop.f32.mrf.mxu0 }
  0xcd   : > { %v667_v44 = vadd.f32 %v666_v43, %v356_v33  ;;  %v685_v45 = vpop.f32.mrf.mxu3  ;;  %v650_v47 = vpop.f32.mrf.mxu1  ;;  %v632_v51 = vadd.f32 %v631_v46, %v355_v29 }
  0xcf   : > { %v686_v49 = vadd.f32 %v685_v45, %v667_v44  ;;  %v651_v53 = vadd.f32 %v650_v47, %v632_v51 }
  0xd1   : > { %v733_v50 = vpack.c.bf16 %v686_v49, %v648_v48 }
  0xd2   : > { %v774_v24 = vld [vmem:[%s1566_s27] sm:$0xff] (%p1406_p9) }
  0xd3   : > { %741 = vst [vmem:[%s1566_s27 + $0xc] sm:$0xff] %v733_v50 }
  0xd4   : > { %v669_v52 = vpop.f32.mrf.mxu2  ;;  %v633_v56 = vpop.f32.mrf.mxu0  ;;  %775 = vst [vmem:[%s759_s30] sm:$0xff] (%p1406_p9), %v774_v24 }
  0xd5   : > { %v670_v54 = vadd.f32 %v669_v52, %v356_v33  ;;  %v688_v55 = vpop.f32.mrf.mxu3  ;;  %v652_v57 = vpop.f32.mrf.mxu1  ;;  %v634_v60 = vadd.f32 %v633_v56, %v355_v29 }
  0xd7   : > { %v689_v58 = vadd.f32 %v688_v55, %v670_v54  ;;  %v653_v2 = vadd.f32 %v652_v57, %v634_v60 }
  0xd9   : > { %v735_v59 = vpack.c.bf16 %v689_v58, %v651_v53 }
  0xda   : > { %v776_v25 = vld [vmem:[%s1566_s27 + $0xc] sm:$0xff] (%p1406_p9) }
  0xdb   : > { %743 = vst [vmem:[%s1566_s27 + $0x18] sm:$0xff] %v735_v59 }
  0xdc   : > { %v671_v62 = vpop.f32.mrf.mxu2  ;;  %v702_v1 = vpop.f32.mrf.mxu0  ;;  %777 = vst [vmem:[%s759_s30 + $0x18] sm:$0xff] (%p1406_p9), %v776_v25 }
  0xdd   : > { %v672_v63 = vadd.f32 %v671_v62, %v356_v33  ;;  %v690_v0 = vpop.f32.mrf.mxu3  ;;  %v703_v4 = vadd.f32 %v702_v1, %v357_v61  ;;  %v721_v5 = vpop.f32.mrf.mxu1 }
  0xdf   : > { %v691_v3 = vadd.f32 %v690_v0, %v672_v63  ;;  %v722_v7 = vadd.f32 %v721_v5, %v703_v4 }
  0xe1   : > { %v737_v6 = vpack.c.bf16 %v691_v3, %v653_v2  ;;  %v732_v8 = vpack.c.bf16 %v722_v7, %v722_v7 }
  0xe2   : > { %v778_v26 = vld [vmem:[%s1566_s27 + $0x18] sm:$0xff] (%p1406_p9) }
  0xe3   : > { %745 = vst [vmem:[%s1566_s27 + $0x24] sm:$0xff] %v737_v6 }
  0xe4   : > { %v707_v9 = vpop.f32.mrf.mxu2  ;;  %740 = vst [vmem:[%s1566_s27 + $0x8] sm:$0xf] %v732_v8  ;;  %v704_v12 = vpop.f32.mrf.mxu0 }
  0xe5   : > { %v708_v10 = vadd.f32 %v707_v9, %v357_v61  ;;  %v726_v11 = vpop.f32.mrf.mxu3  ;;  %v705_v14 = vadd.f32 %v704_v12, %v357_v61  ;;  %v723_v15 = vpop.f32.mrf.mxu1  ;;  %779 = vst [vmem:[%s759_s30 + $0x30] sm:$0xff] (%p1406_p9), %v778_v26 }
  0xe7   : > { %v727_v13 = vadd.f32 %v726_v11, %v708_v10  ;;  %v724_v17 = vadd.f32 %v723_v15, %v705_v14 }
  0xe9   : > { %v736_v16 = vpack.c.bf16 %v727_v13, %v727_v13  ;;  %v734_v18 = vpack.c.bf16 %v724_v17, %v724_v17 }
  0xea   : > { %v780_v27 = vld [vmem:[%s1566_s27 + $0x24] sm:$0xff] (%p1406_p9) }
  0xeb   : > { %744 = vst [vmem:[%s1566_s27 + $0x20] sm:$0xf] %v736_v16  ;;  %v1114_v28 = vld [vmem:[%s1566_s27 + $0x8] sm:$0xf] (%p1406_p9) }
  0xec   : > { %v709_v19 = vpop.f32.mrf.mxu2  ;;  %742 = vst [vmem:[%s1566_s27 + $0x14] sm:$0xf] %v734_v18 }
  0xed   : > { %v710_v20 = vadd.f32 %v709_v19, %v357_v61  ;;  %v728_v21 = vpop.f32.mrf.mxu3  ;;  %781 = vst [vmem:[%s759_s30 + $0x48] sm:$0xff] (%p1406_p9), %v780_v27 }
  0xee   : > { %1115 = vst [vmem:[%s759_s30 + $0x8] sm:$0xf] (%p1406_p9), %v1114_v28 }
  0xef   : > { %v729_v22 = vadd.f32 %v728_v21, %v710_v20  ;;  %753 = sbr.rel (!%p1406_p9) target bundleno = 252 (0xfc), region = 40 }
  0xf1   : > { %v738_v23 = vpack.c.bf16 %v729_v22, %v729_v22 }
  0xf2   : > { %v1118_v30 = vld [vmem:[%s1566_s27 + $0x20] sm:$0xf] (%p1406_p9) }
  0xf3   : > { %746 = vst [vmem:[%s1566_s27 + $0x2c] sm:$0xf] %v738_v23  ;;  %v1116_v29 = vld [vmem:[%s1566_s27 + $0x14] sm:$0xf] (%p1406_p9) }
  0xf4   : > { %1117 = vst [vmem:[%s759_s30 + $0x20] sm:$0xf] %v1116_v29 }
  0xf5   : > { %1119 = vst [vmem:[%s759_s30 + $0x38] sm:$0xf] %v1118_v30 }
  0xfa   : > { %v1120_v31 = vld [vmem:[%s1566_s27 + $0x2c] sm:$0xf] }
  0xfb   : > { %1121 = vst [vmem:[%s759_s30 + $0x50] sm:$0xf] %v1120_v31 }
  0xfc PF: > { %s16_s17 = sadd.s32 1, %s1331_s17   ;;  %s1615_s12 = smov %s1315_s13 }
  0xfd   : > { %p13_p2 = scmp.ge.s32.totalorder %s16_s17, 4   ;;  %s1616_s13 = smov %s1319_s14 }
  0xfe   : > { %s1617_s14 = smov %s1404_s24  ;;  %s1618_s15 = smov %s1327_s16 }
  0xff   : > { %s1619_s16 = smov %s1621_s19  ;;  %15 = sbr.rel (!%p13_p2) target bundleno = 4 (0x4), region = 110 }
 0x104   :  { %813 = vsyncpa [#allocation4], 1 }
 0x105   :  { %815 = vsyncpa [#allocation4 + $0x1], 1 }

// kernel: transformer_encoder_layer.4
= control target key start
LH: loop header
LB: loop body
LE: loop exit
PB: predicated region body
PF: predicated region fallthrough
CT: control target
= control target key end

     0   :  { %s1022_s1 = inlined_call_operand.vmem [shape: bf16[256,256], index: 1, kind: input, shape index: {}]   ;;  %s1023_s0 = inlined_call_operand.vmem [shape: f32[32,256], index: 0, kind: input, shape index: {}]   ;;  %s1024_s3 = inlined_call_operand.vmem [shape: f32[32,256], index: 3, kind: input, shape index: {}]   ;;  %s1025_s2 = inlined_call_operand.vmem [shape: f32[1,256], index: 2, kind: input, shape index: {}]   ;;  %s1026_s4 = inlined_call_operand.vmem [shape: f32[1,256], index: 4, kind: input, shape index: {}]   ;;  %s1027_s5 = inlined_call_operand.vmem [shape: f32[1,256], index: 5, kind: input, shape index: {}]   ;;  %s1028_s6 = inlined_call_operand.vmem [shape: f32[32,256], index: 6, kind: output, shape index: {}]  }
   0x1   :  { %v538_v0 = vld [vmem:[%s1022_s1 + $0x70] sm:$0xf]  ;;  %v623_v1 = vld [vmem:[%s1022_s1 + $0x74] sm:$0xf0]  ;;  %v622_v5 = vld [vmem:[%s1022_s1 + $0x74] sm:$0xf] }
   0x2   :  { %v602_v2 = vld [vmem:[%s1022_s1 + $0xf0] sm:$0xf]  ;;  %v539_v3 = vor.u32 %v623_v1, %v538_v0  ;;  %v639_v4 = vld [vmem:[%s1022_s1 + $0xf4] sm:$0xf0]  ;;  %v540_v6 = vld [vmem:[%s1022_s1 + $0x78] sm:$0xf0] }
   0x3   :  { %v603_v7 = vor.u32 %v639_v4, %v602_v2  ;;  %v543_v8 = vor.u32 %v622_v5, %v540_v6  ;;  %v638_v9 = vld [vmem:[%s1022_s1 + $0xf4] sm:$0xf]  ;;  %v604_v10 = vld [vmem:[%s1022_s1 + $0xf8] sm:$0xf0]  ;;  %v530_v11 = vld [vmem:[%s1022_s1 + $0x60] sm:$0xf] }
   0x4   :  { %227 = vmatpush.bf16.msra.mxu0 %v539_v3  ;;  %v607_v12 = vor.u32 %v638_v9, %v604_v10  ;;  %v621_v13 = vld [vmem:[%s1022_s1 + $0x64] sm:$0xf0]  ;;  %v594_v14 = vld [vmem:[%s1022_s1 + $0xe0] sm:$0xf]  ;;  %v620_v18 = vld [vmem:[%s1022_s1 + $0x64] sm:$0xf] }
   0x5   :  { %v637_v15 = vld [vmem:[%s1022_s1 + $0xe4] sm:$0xf0]  ;;  %246 = vmatpush.bf16.msra.mxu1 %v603_v7  ;;  %265 = vmatpush.bf16.msra.mxu2 %v543_v8  ;;  %v531_v16 = vor.u32 %v621_v13, %v530_v11  ;;  %v532_v19 = vld [vmem:[%s1022_s1 + $0x68] sm:$0xf0]  ;;  %v636_v20 = vld [vmem:[%s1022_s1 + $0xe4] sm:$0xf] }
   0x6   :  { %v595_v17 = vor.u32 %v637_v15, %v594_v14  ;;  %284 = vmatpush.bf16.msra.mxu3 %v607_v12  ;;  %v535_v21 = vor.u32 %v620_v18, %v532_v19  ;;  %v596_v22 = vld [vmem:[%s1022_s1 + $0xe8] sm:$0xf0]  ;;  %v522_v23 = vld [vmem:[%s1022_s1 + $0x50] sm:$0xf]  ;;  %v619_v24 = vld [vmem:[%s1022_s1 + $0x54] sm:$0xf0] }
   0x7   :  { %v599_v25 = vor.u32 %v636_v20, %v596_v22  ;;  %v586_v26 = vld [vmem:[%s1022_s1 + $0xd0] sm:$0xf]  ;;  %v635_v27 = vld [vmem:[%s1022_s1 + $0xd4] sm:$0xf0]  ;;  %v618_v28 = vld [vmem:[%s1022_s1 + $0x54] sm:$0xf]  ;;  %v523_v29 = vor.u32 %v619_v24, %v522_v23 }
   0x8   :  { %228 = vmatpush.bf16.msra.mxu0 %v531_v16  ;;  %v524_v30 = vld [vmem:[%s1022_s1 + $0x58] sm:$0xf0]  ;;  %v634_v31 = vld [vmem:[%s1022_s1 + $0xd4] sm:$0xf]  ;;  %v587_v33 = vor.u32 %v635_v27, %v586_v26  ;;  %v514_v35 = vld [vmem:[%s1022_s1 + $0x40] sm:$0xf] }
   0x9   :  { %v588_v32 = vld [vmem:[%s1022_s1 + $0xd8] sm:$0xf0]  ;;  %247 = vmatpush.bf16.msra.mxu1 %v595_v17  ;;  %266 = vmatpush.bf16.msra.mxu2 %v535_v21  ;;  %v527_v34 = vor.u32 %v618_v28, %v524_v30  ;;  %v617_v36 = vld [vmem:[%s1022_s1 + $0x44] sm:$0xf0]  ;;  %v578_v37 = vld [vmem:[%s1022_s1 + $0xc0] sm:$0xf] }
   0xa   :  { %285 = vmatpush.bf16.msra.mxu3 %v599_v25  ;;  %v591_v38 = vor.u32 %v634_v31, %v588_v32  ;;  %v633_v39 = vld [vmem:[%s1022_s1 + $0xc4] sm:$0xf0]  ;;  %v616_v40 = vld [vmem:[%s1022_s1 + $0x44] sm:$0xf]  ;;  %v516_v41 = vld [vmem:[%s1022_s1 + $0x48] sm:$0xf0]  ;;  %v515_v44 = vor.u32 %v617_v36, %v514_v35 }
   0xb   :  { %v632_v42 = vld [vmem:[%s1022_s1 + $0xc4] sm:$0xf]  ;;  %v580_v43 = vld [vmem:[%s1022_s1 + $0xc8] sm:$0xf0]  ;;  %v579_v45 = vor.u32 %v633_v39, %v578_v37  ;;  %v519_v46 = vor.u32 %v616_v40, %v516_v41  ;;  %v506_v47 = vld [vmem:[%s1022_s1 + $0x30] sm:$0xf] }
   0xc   :  { %229 = vmatpush.bf16.msra.mxu0 %v523_v29  ;;  %v615_v48 = vld [vmem:[%s1022_s1 + $0x34] sm:$0xf0]  ;;  %v570_v49 = vld [vmem:[%s1022_s1 + $0xb0] sm:$0xf]  ;;  %v583_v50 = vor.u32 %v632_v42, %v580_v43  ;;  %v614_v52 = vld [vmem:[%s1022_s1 + $0x34] sm:$0xf] }
   0xd   :  { %248 = vmatpush.bf16.msra.mxu1 %v587_v33  ;;  %267 = vmatpush.bf16.msra.mxu2 %v527_v34  ;;  %v631_v51 = vld [vmem:[%s1022_s1 + $0xb4] sm:$0xf0]  ;;  %v508_v53 = vld [vmem:[%s1022_s1 + $0x38] sm:$0xf0]  ;;  %v630_v54 = vld [vmem:[%s1022_s1 + $0xb4] sm:$0xf]  ;;  %v507_v56 = vor.u32 %v615_v48, %v506_v47 }
   0xe   :  { %286 = vmatpush.bf16.msra.mxu3 %v591_v38  ;;  %v572_v55 = vld [vmem:[%s1022_s1 + $0xb8] sm:$0xf0]  ;;  %v571_v57 = vor.u32 %v631_v51, %v570_v49  ;;  %v511_v58 = vor.u32 %v614_v52, %v508_v53  ;;  %v498_v59 = vld [vmem:[%s1022_s1 + $0x20] sm:$0xf]  ;;  %v613_v60 = vld [vmem:[%s1022_s1 + $0x24] sm:$0xf0] }
   0xf   :  { %v562_v61 = vld [vmem:[%s1022_s1 + $0xa0] sm:$0xf]  ;;  %v575_v62 = vor.u32 %v630_v54, %v572_v55  ;;  %v629_v63 = vld [vmem:[%s1022_s1 + $0xa4] sm:$0xf0]  ;;  %v612_v0 = vld [vmem:[%s1022_s1 + $0x24] sm:$0xf]  ;;  %v499_v4 = vor.u32 %v613_v60, %v498_v59 }
  0x10   :  { %230 = vmatpush.bf16.msra.mxu0 %v515_v44  ;;  %v500_v1 = vld [vmem:[%s1022_s1 + $0x28] sm:$0xf0]  ;;  %v628_v2 = vld [vmem:[%s1022_s1 + $0xa4] sm:$0xf]  ;;  %v563_v5 = vor.u32 %v629_v63, %v562_v61  ;;  %v490_v7 = vld [vmem:[%s1022_s1 + $0x10] sm:$0xf] }
  0x11   :  { %249 = vmatpush.bf16.msra.mxu1 %v579_v45  ;;  %268 = vmatpush.bf16.msra.mxu2 %v519_v46  ;;  %v564_v3 = vld [vmem:[%s1022_s1 + $0xa8] sm:$0xf0]  ;;  %v503_v6 = vor.u32 %v612_v0, %v500_v1  ;;  %v611_v8 = vld [vmem:[%s1022_s1 + $0x14] sm:$0xf0]  ;;  %v554_v9 = vld [vmem:[%s1022_s1 + $0x90] sm:$0xf] }
  0x12   :  { %287 = vmatpush.bf16.msra.mxu3 %v583_v50  ;;  %v567_v10 = vor.u32 %v628_v2, %v564_v3  ;;  %v627_v11 = vld [vmem:[%s1022_s1 + $0x94] sm:$0xf0]  ;;  %v610_v12 = vld [vmem:[%s1022_s1 + $0x14] sm:$0xf]  ;;  %v492_v13 = vld [vmem:[%s1022_s1 + $0x18] sm:$0xf0]  ;;  %v491_v16 = vor.u32 %v611_v8, %v490_v7 }
  0x13   :  { %v626_v14 = vld [vmem:[%s1022_s1 + $0x94] sm:$0xf]  ;;  %v556_v15 = vld [vmem:[%s1022_s1 + $0x98] sm:$0xf0]  ;;  %v555_v17 = vor.u32 %v627_v11, %v554_v9  ;;  %v495_v18 = vor.u32 %v610_v12, %v492_v13  ;;  %v482_v19 = vld [vmem:[%s1022_s1] sm:$0xf] }
  0x14   :  { %231 = vmatpush.bf16.msra.mxu0 %v507_v56  ;;  %v609_v20 = vld [vmem:[%s1022_s1 + $0x4] sm:$0xf0]  ;;  %v546_v21 = vld [vmem:[%s1022_s1 + $0x80] sm:$0xf]  ;;  %v559_v22 = vor.u32 %v626_v14, %v556_v15  ;;  %v608_v24 = vld [vmem:[%s1022_s1 + $0x4] sm:$0xf] }
  0x15   :  { %250 = vmatpush.bf16.msra.mxu1 %v571_v57  ;;  %269 = vmatpush.bf16.msra.mxu2 %v511_v58  ;;  %v625_v23 = vld [vmem:[%s1022_s1 + $0x84] sm:$0xf0]  ;;  %v484_v25 = vld [vmem:[%s1022_s1 + $0x8] sm:$0xf0]  ;;  %v624_v26 = vld [vmem:[%s1022_s1 + $0x84] sm:$0xf]  ;;  %v483_v28 = vor.u32 %v609_v20, %v482_v19 }
  0x16   :  { %288 = vmatpush.bf16.msra.mxu3 %v575_v62  ;;  %v548_v27 = vld [vmem:[%s1022_s1 + $0x88] sm:$0xf0]  ;;  %v23_v29 = vld [vmem:[%s1023_s0] sm:$0xff]  ;;  %v25_v30 = vld [vmem:[%s1023_s0 + $0x10] sm:$0xff]  ;;  %v547_v31 = vor.u32 %v625_v23, %v546_v21  ;;  %v487_v32 = vor.u32 %v608_v24, %v484_v25 }
  0x17   :  { %v24_v33 = vld [vmem:[%s1023_s0 + $0x8] sm:$0xff]  ;;  %v26_v34 = vld [vmem:[%s1023_s0 + $0x18] sm:$0xff]  ;;  %v551_v35 = vor.u32 %v624_v26, %v548_v27  ;;  %v31_v36 = vpack.c.bf16 %v25_v30, %v23_v29  ;;  %v27_v38 = vld [vmem:[%s1023_s0 + $0x20] sm:$0xff] }
  0x18   :  { %232 = vmatpush.bf16.msra.mxu0 %v499_v4  ;;  %v32_v37 = vpack.c.bf16 %v26_v34, %v24_v33  ;;  %v29_v39 = vld [vmem:[%s1023_s0 + $0x30] sm:$0xff]  ;;  %v28_v40 = vld [vmem:[%s1023_s0 + $0x28] sm:$0xff]  ;;  %v30_v41 = vld [vmem:[%s1023_s0 + $0x38] sm:$0xff] }
  0x19   :  { %251 = vmatpush.bf16.msra.mxu1 %v563_v5  ;;  %270 = vmatpush.bf16.msra.mxu2 %v503_v6  ;;  %v33_v42 = vpack.c.bf16 %v29_v39, %v27_v38  ;;  %v34_v43 = vpack.c.bf16 %v30_v41, %v28_v40  ;;  %v303_v47 = vld [vmem:[%s1024_s3] sm:$0xff]  ;;  %v304_v53 = vld [vmem:[%s1024_s3 + $0x8] sm:$0xff]  ;;  %v305_v62 = vld [vmem:[%s1024_s3 + $0x10] sm:$0xff] }
  0x1a   :  { %289 = vmatpush.bf16.msra.mxu3 %v567_v10  ;;  %v319_v48 = vld [vmem:[%s1025_s2] sm:$0x3]  ;;  %v306_v2 = vld [vmem:[%s1024_s3 + $0x18] sm:$0xff]  ;;  %v309_v24 = vld [vmem:[%s1024_s3 + $0x30] sm:$0xff] }
  0x1b   :  { %v321_v51 = vperm.slane %v319_v48, 0  ;;  %v322_v57 = vperm.slane %v319_v48, 1  ;;  %v307_v9 = vld [vmem:[%s1024_s3 + $0x20] sm:$0xff] }
  0x1c   :  { %233 = vmatpush.bf16.msra.mxu0 %v491_v16  ;;  %v308_v16 = vld [vmem:[%s1024_s3 + $0x28] sm:$0xff] }
  0x1d   :  { %252 = vmatpush.bf16.msra.mxu1 %v555_v17  ;;  %271 = vmatpush.bf16.msra.mxu2 %v495_v18 }
  0x1e   :  { %290 = vmatpush.bf16.msra.mxu3 %v559_v22 }
  0x20   :  { %234 = vmatpush.bf16.msra.mxu0 %v483_v28  ;;  %v310_v28 = vld [vmem:[%s1024_s3 + $0x38] sm:$0xff] }
  0x21   :  { %253 = vmatpush.bf16.msra.mxu1 %v547_v31  ;;  %272 = vmatpush.bf16.msra.mxu2 %v487_v32 }
  0x22   :  { %291 = vmatpush.bf16.msra.mxu3 %v551_v35  ;;  %v651_v35 = vmov 256.0  }
  0x23   :  { %235 = vmatmul.bf16.vlgmr.msra.gmra.mxu0 %v31_v36  ;;  %641 = vrcp.f32 %v651_v35 }
  0x24   :  { %254 = vmatmul.bf16.vlgmr.msra.gmra.mxu1 %v32_v37  ;;  %273 = vmatmul.bf16.vlgmr.msra.gmra.mxu2 %v31_v36 }
  0x25   :  { %292 = vmatmul.bf16.vlgmr.msra.gmra.mxu3 %v32_v37 }
  0x29   :  { %v642_v36 = vpop.eup %641 }
  0x2a   :  { %v346_v37 = vmul.f32 256.0, %v642_v36  ;;  %vm350_vm0 = vweird.f32 %v642_v36 }
  0x2c   :  { %v347_v38 = vsub.f32 1.0, %v346_v37 }
  0x2e   :  { %v348_v39 = vmul.f32 %v642_v36, %v347_v38 }
  0x30   :  { %v349_v40 = vadd.f32 %v642_v36, %v348_v39 }
  0x32   :  { %v930_v41 = vsel %vm350_vm0, %v642_v36, %v349_v40 }
  0x33   :  { %240 = vmatmul.bf16.gmra.mxu0 %v33_v42 }
  0x34   :  { %259 = vmatmul.bf16.gmra.mxu1 %v34_v43  ;;  %278 = vmatmul.bf16.gmra.mxu2 %v33_v42 }
  0x35   :  { %297 = vmatmul.bf16.gmra.mxu3 %v34_v43 }
  0xa0   :  { %v236_v44 = vpop.f32.mrf.mxu0 }
  0xa1   :  { %v255_v45 = vpop.f32.mrf.mxu1 }
  0xa2   :  { %v256_v46 = vadd.f32 %v255_v45, %v236_v44 }
  0xa4   :  { %v311_v49 = vadd.f32 %v303_v47, %v256_v46 }
  0xa6   :  { %v325_v59 = vadd.f32 %v321_v51, %v311_v49 }
  0xa7   :  { %v274_v50 = vpop.f32.mrf.mxu2 }
  0xa8   :  { %v293_v52 = vpop.f32.mrf.mxu3  ;;  %v238_v54 = vpop.f32.mrf.mxu0 }
  0xa9   :  { %v294_v55 = vadd.f32 %v293_v52, %v274_v50  ;;  %v257_v56 = vpop.f32.mrf.mxu1 }
  0xaa   :  { %v258_v60 = vadd.f32 %v257_v56, %v238_v54 }
  0xab   :  { %v312_v58 = vadd.f32 %v304_v53, %v294_v55 }
  0xac   :  { %v313_v4 = vadd.f32 %v305_v62, %v258_v60 }
  0xad   :  { %v326_v61 = vadd.f32 %v322_v57, %v312_v58 }
  0xae   :  { %v327_v10 = vadd.f32 %v321_v51, %v313_v4 }
  0xaf   :  { %v276_v63 = vpop.f32.mrf.mxu2  ;;  %v333_v0 = vadd.f32 %v326_v61, %v325_v59 }
  0xb0   :  { %v295_v1 = vpop.f32.mrf.mxu3  ;;  %v241_v3 = vpop.f32.mrf.mxu0 }
  0xb1   :  { %v296_v5 = vadd.f32 %v295_v1, %v276_v63  ;;  %334 = vadd.xlane.f32.xlu0 %v333_v0  ;;  %v260_v6 = vpop.f32.mrf.mxu1 }
  0xb2   :  { %v261_v8 = vadd.f32 %v260_v6, %v241_v3 }
  0xb3   :  { %v314_v7 = vadd.f32 %v306_v2, %v296_v5 }
  0xb4   :  { %v315_v12 = vadd.f32 %v307_v9, %v261_v8 }
  0xb5   :  { %v328_v11 = vadd.f32 %v322_v57, %v314_v7 }
  0xb6   :  { %v329_v21 = vadd.f32 %v321_v51, %v315_v12 }
  0xb7   :  { %v279_v13 = vpop.f32.mrf.mxu2  ;;  %v336_v14 = vadd.f32 %v328_v11, %v327_v10 }
  0xb8   :  { %v298_v15 = vpop.f32.mrf.mxu3  ;;  %v243_v18 = vpop.f32.mrf.mxu0 }
  0xb9   :  { %v299_v17 = vadd.f32 %v298_v15, %v279_v13  ;;  %337 = vadd.xlane.f32.xlu0 %v336_v14  ;;  %v262_v19 = vpop.f32.mrf.mxu1 }
  0xba   :  { %v263_v22 = vadd.f32 %v262_v19, %v243_v18  ;;  %v440_v18 = vld [vmem:[%s1026_s4] sm:$0x3] }
  0xbb   :  { %v316_v20 = vadd.f32 %v308_v16, %v299_v17 }
  0xbc   :  { %v317_v29 = vadd.f32 %v309_v24, %v263_v22  ;;  %v454_v22 = vld [vmem:[%s1027_s5] sm:$0x3] }
  0xbd   :  { %v330_v23 = vadd.f32 %v322_v57, %v316_v20 }
  0xbe   :  { %v331_v32 = vadd.f32 %v321_v51, %v317_v29  ;;  %v456_v29 = vperm.slane %v454_v22, 0 }
  0xbf   :  { %v281_v25 = vpop.f32.mrf.mxu2  ;;  %v339_v26 = vadd.f32 %v330_v23, %v329_v21 }
  0xc0   :  { %v300_v27 = vpop.f32.mrf.mxu3 }
  0xc1   :  { %v301_v30 = vadd.f32 %v300_v27, %v281_v25  ;;  %340 = vadd.xlane.f32.xlu1 %v339_v26  ;;  %v977_v25 = vperm.slane %v440_v18, 0  ;;  %v979_v26 = vperm.slane %v440_v18, 1 }
  0xc3   :  { %v318_v31 = vadd.f32 %v310_v28, %v301_v30  ;;  %v457_v30 = vperm.slane %v454_v22, 1 }
  0xc5   :  { %v332_v33 = vadd.f32 %v322_v57, %v318_v31 }
  0xc7   :  { %v342_v34 = vadd.f32 %v332_v33, %v331_v32 }
  0xc9   :  { %343 = vadd.xlane.f32.xlu1 %v342_v34 }
 0x124   :  { %v335_v42 = vpop.xlane.xlu0 %334 }
 0x125   :  { %v352_v43 = vmul.f32 %v930_v41, %v335_v42 }
 0x127   :  { %v933_v44 = vsub.f32 %v325_v59, %v352_v43  ;;  %v935_v45 = vsub.f32 %v326_v61, %v352_v43 }
 0x129   :  { %v364_v46 = vmul.f32 %v933_v44, %v933_v44  ;;  %v365_v47 = vmul.f32 %v935_v45, %v935_v45 }
 0x12b   :  { %v372_v48 = vadd.f32 %v365_v47, %v364_v46 }
 0x12c   :  { %v338_v49 = vpop.xlane.xlu0 %337 }
 0x12d   :  { %v353_v50 = vmul.f32 %v930_v41, %v338_v49  ;;  %373 = vadd.xlane.f32.xlu2 %v372_v48 }
 0x12f   :  { %v942_v51 = vsub.f32 %v327_v10, %v353_v50  ;;  %v944_v52 = vsub.f32 %v328_v11, %v353_v50 }
 0x131   :  { %v366_v53 = vmul.f32 %v942_v51, %v942_v51  ;;  %v367_v54 = vmul.f32 %v944_v52, %v944_v52 }
 0x133   :  { %v375_v55 = vadd.f32 %v367_v54, %v366_v53 }
 0x134   :  { %v341_v56 = vpop.xlane.xlu1 %340 }
 0x135   :  { %v354_v57 = vmul.f32 %v930_v41, %v341_v56  ;;  %376 = vadd.xlane.f32.xlu2 %v375_v55 }
 0x137   :  { %v951_v58 = vsub.f32 %v329_v21, %v354_v57  ;;  %v953_v59 = vsub.f32 %v330_v23, %v354_v57 }
 0x139   :  { %v368_v60 = vmul.f32 %v951_v58, %v951_v58  ;;  %v369_v61 = vmul.f32 %v953_v59, %v953_v59 }
 0x13b   :  { %v378_v62 = vadd.f32 %v369_v61, %v368_v60 }
 0x13c   :  { %v344_v63 = vpop.xlane.xlu1 %343 }
 0x13d   :  { %v355_v0 = vmul.f32 %v930_v41, %v344_v63  ;;  %379 = vadd.xlane.f32.xlu0 %v378_v62 }
 0x13f   :  { %v960_v1 = vsub.f32 %v331_v32, %v355_v0  ;;  %v962_v2 = vsub.f32 %v332_v33, %v355_v0 }
 0x141   :  { %v370_v3 = vmul.f32 %v960_v1, %v960_v1  ;;  %v371_v4 = vmul.f32 %v962_v2, %v962_v2 }
 0x143   :  { %v381_v5 = vadd.f32 %v371_v4, %v370_v3 }
 0x145   :  { %382 = vadd.xlane.f32.xlu1 %v381_v5 }
 0x1a0   :  { %v374_v6 = vpop.xlane.xlu2 %373 }
 0x1a1   :  { %v384_v7 = vmul.f32 %v374_v6, %v930_v41 }
 0x1a3   :  { %v388_v8 = vadd.f32 1e-05, %v384_v7 }
 0x1a5   :  { %643 = vrsqrt.f32 %v388_v8  ;;  %vm398_vm2 = vweird.f32 %v388_v8 }
 0x1a8   :  { %v377_v9 = vpop.xlane.xlu2 %376 }
 0x1a9   :  { %v385_v10 = vmul.f32 %v377_v9, %v930_v41 }
 0x1ab   :  { %v644_v11 = vpop.eup %643  ;;  %v389_v12 = vadd.f32 1e-05, %v385_v10 }
 0x1ac   :  { %v393_v13 = vmul.f32 %v644_v11, %v388_v8  ;;  %vm399_vm1 = vweird.f32 %v644_v11 }
 0x1ad   :  { %645 = vrsqrt.f32 %v389_v12  ;;  %vm400_vm3 = vmor %vm398_vm2, %vm399_vm1  ;;  %vm408_vm5 = vweird.f32 %v389_v12 }
 0x1ae   :  { %v394_v14 = vmul.f32 %v644_v11, %v393_v13 }
 0x1b0   :  { %v395_v15 = vmul.f32 0.5, %v394_v14  ;;  %v380_v16 = vpop.xlane.xlu0 %379 }
 0x1b1   :  { %v386_v17 = vmul.f32 %v380_v16, %v930_v41 }
 0x1b2   :  { %v396_v19 = vsub.f32 1.5, %v395_v15 }
 0x1b3   :  { %v646_v20 = vpop.eup %645  ;;  %v390_v21 = vadd.f32 1e-05, %v386_v17 }
 0x1b4   :  { %v397_v23 = vmul.f32 %v644_v11, %v396_v19  ;;  %v403_v24 = vmul.f32 %v646_v20, %v389_v12  ;;  %vm409_vm4 = vweird.f32 %v646_v20 }
 0x1b5   :  { %647 = vrsqrt.f32 %v390_v21  ;;  %vm410_vm6 = vmor %vm408_vm5, %vm409_vm4  ;;  %vm418_vm8 = vweird.f32 %v390_v21 }
 0x1b6   :  { %v401_v27 = vsel %vm400_vm3, %v644_v11, %v397_v23  ;;  %v404_v28 = vmul.f32 %v646_v20, %v403_v24 }
 0x1b7   :  { %v432_v31 = vmul.f32 %v401_v27, %v933_v44  ;;  %v433_v32 = vmul.f32 %v401_v27, %v935_v45 }
 0x1b8   :  { %v405_v33 = vmul.f32 0.5, %v404_v28  ;;  %v383_v34 = vpop.xlane.xlu1 %382 }
 0x1b9   :  { %v446_v35 = vmul.f32 %v977_v25, %v432_v31  ;;  %v447_v36 = vmul.f32 %v979_v26, %v433_v32  ;;  %v387_v37 = vmul.f32 %v383_v34, %v930_v41 }
 0x1ba   :  { %v406_v38 = vsub.f32 1.5, %v405_v33 }
 0x1bb   :  { %v648_v39 = vpop.eup %647  ;;  %v460_v40 = vadd.f32 %v456_v29, %v446_v35  ;;  %v461_v42 = vadd.f32 %v457_v30, %v447_v36  ;;  %v391_v43 = vadd.f32 1e-05, %v387_v37 }
 0x1bc   :  { %v407_v46 = vmul.f32 %v646_v20, %v406_v38  ;;  %v413_v47 = vmul.f32 %v648_v39, %v390_v21  ;;  %vm419_vm7 = vweird.f32 %v648_v39 }
 0x1bd   :  { %468 = vst [vmem:[%s1028_s6] sm:$0xff] %v460_v40  ;;  %649 = vrsqrt.f32 %v391_v43  ;;  %vm420_vm9 = vmor %vm418_vm8, %vm419_vm7  ;;  %vm428_vm11 = vweird.f32 %v391_v43 }
 0x1be   :  { %469 = vst [vmem:[%s1028_s6 + $0x8] sm:$0xff] %v461_v42  ;;  %v411_v41 = vsel %vm410_vm6, %v646_v20, %v407_v46  ;;  %v414_v44 = vmul.f32 %v648_v39, %v413_v47 }
 0x1bf   :  { %v434_v45 = vmul.f32 %v411_v41, %v942_v51  ;;  %v435_v48 = vmul.f32 %v411_v41, %v944_v52 }
 0x1c0   :  { %v415_v49 = vmul.f32 0.5, %v414_v44 }
 0x1c1   :  { %v448_v50 = vmul.f32 %v977_v25, %v434_v45  ;;  %v449_v53 = vmul.f32 %v979_v26, %v435_v48 }
 0x1c2   :  { %v416_v54 = vsub.f32 1.5, %v415_v49 }
 0x1c3   :  { %v650_v55 = vpop.eup %649  ;;  %v462_v56 = vadd.f32 %v456_v29, %v448_v50  ;;  %v463_v57 = vadd.f32 %v457_v30, %v449_v53 }
 0x1c4   :  { %v417_v60 = vmul.f32 %v648_v39, %v416_v54  ;;  %v423_v61 = vmul.f32 %v650_v55, %v391_v43  ;;  %vm429_vm10 = vweird.f32 %v650_v55 }
 0x1c5   :  { %470 = vst [vmem:[%s1028_s6 + $0x10] sm:$0xff] %v462_v56  ;;  %vm430_vm12 = vmor %vm428_vm11, %vm429_vm10 }
 0x1c6   :  { %471 = vst [vmem:[%s1028_s6 + $0x18] sm:$0xff] %v463_v57  ;;  %v421_v51 = vsel %vm420_vm9, %v648_v39, %v417_v60  ;;  %v424_v52 = vmul.f32 %v650_v55, %v423_v61 }
 0x1c7   :  { %v436_v62 = vmul.f32 %v421_v51, %v951_v58  ;;  %v437_v63 = vmul.f32 %v421_v51, %v953_v59 }
 0x1c8   :  { %v425_v0 = vmul.f32 0.5, %v424_v52 }
 0x1c9   :  { %v450_v3 = vmul.f32 %v977_v25, %v436_v62  ;;  %v451_v4 = vmul.f32 %v979_v26, %v437_v63 }
 0x1ca   :  { %v426_v5 = vsub.f32 1.5, %v425_v0 }
 0x1cb   :  { %v464_v6 = vadd.f32 %v456_v29, %v450_v3  ;;  %v465_v7 = vadd.f32 %v457_v30, %v451_v4 }
 0x1cc   :  { %v427_v8 = vmul.f32 %v650_v55, %v426_v5 }
 0x1cd   :  { %472 = vst [vmem:[%s1028_s6 + $0x20] sm:$0xff] %v464_v6 }
 0x1ce   :  { %473 = vst [vmem:[%s1028_s6 + $0x28] sm:$0xff] %v465_v7  ;;  %v431_v58 = vsel %vm430_vm12, %v650_v55, %v427_v8 }
 0x1cf   :  { %v438_v59 = vmul.f32 %v431_v58, %v960_v1  ;;  %v439_v9 = vmul.f32 %v431_v58, %v962_v2 }
 0x1d1   :  { %v452_v10 = vmul.f32 %v977_v25, %v438_v59  ;;  %v453_v11 = vmul.f32 %v979_v26, %v439_v9 }
 0x1d3   :  { %v466_v12 = vadd.f32 %v456_v29, %v452_v10  ;;  %v467_v13 = vadd.f32 %v457_v30, %v453_v11 }
 0x1d5   :  { %474 = vst [vmem:[%s1028_s6 + $0x30] sm:$0xff] %v466_v12 }
 0x1d6   :  { %475 = vst [vmem:[%s1028_s6 + $0x38] sm:$0xff] %v467_v13 }

// kernel: transformer_encoder_layer.5
= control target key start
LH: loop header
LB: loop body
LE: loop exit
PB: predicated region body
PF: predicated region fallthrough
CT: control target
= control target key end

     0   :  { %s2997_s1 = inlined_call_operand.vmem [shape: bf16[256,512], index: 1, kind: input, shape index: {}]   ;;  %s2998_s0 = inlined_call_operand.vmem [shape: f32[32,256], index: 0, kind: input, shape index: {}]   ;;  %s2999_s3 = inlined_call_operand.vmem [shape: bf16[512,256], index: 3, kind: input, shape index: {}]   ;;  %s3000_s2 = inlined_call_operand.vmem [shape: f32[1,512], index: 2, kind: input, shape index: {}]   ;;  %s3001_s4 = inlined_call_operand.vmem [shape: f32[1,256], index: 4, kind: input, shape index: {}]   ;;  %s3002_s5 = inlined_call_operand.vmem [shape: f32[1,256], index: 5, kind: input, shape index: {}]   ;;  %s3003_s6 = inlined_call_operand.vmem [shape: f32[1,256], index: 6, kind: input, shape index: {}]   ;;  %s3004_s7 = inlined_call_operand.vmem [shape: f32[32,256], index: 7, kind: output, shape index: {}]  }
   0x1   :  { %v1427_v0 = vld [vmem:[%s2997_s1 + $0xe0] sm:$0xf]  ;;  %v1855_v1 = vld [vmem:[%s2997_s1 + $0xec] sm:$0xf0]  ;;  %v1853_v5 = vld [vmem:[%s2997_s1 + $0xe4] sm:$0xf] }
   0x2   :  { %v1555_v2 = vld [vmem:[%s2997_s1 + $0x1e0] sm:$0xf]  ;;  %v1428_v3 = vor.u32 %v1855_v1, %v1427_v0  ;;  %v1887_v4 = vld [vmem:[%s2997_s1 + $0x1ec] sm:$0xf0]  ;;  %v1429_v6 = vld [vmem:[%s2997_s1 + $0xf0] sm:$0xf0] }
   0x3   :  { %v1556_v7 = vor.u32 %v1887_v4, %v1555_v2  ;;  %v1432_v8 = vor.u32 %v1853_v5, %v1429_v6  ;;  %v1885_v9 = vld [vmem:[%s2997_s1 + $0x1e4] sm:$0xf]  ;;  %v1557_v10 = vld [vmem:[%s2997_s1 + $0x1f0] sm:$0xf0]  ;;  %v1411_v11 = vld [vmem:[%s2997_s1 + $0xc0] sm:$0xf] }
   0x4   :  { %432 = vmatpush.bf16.msra.mxu0 %v1428_v3  ;;  %v1560_v12 = vor.u32 %v1885_v9, %v1557_v10  ;;  %v1851_v13 = vld [vmem:[%s2997_s1 + $0xcc] sm:$0xf0]  ;;  %v1539_v14 = vld [vmem:[%s2997_s1 + $0x1c0] sm:$0xf]  ;;  %v1849_v18 = vld [vmem:[%s2997_s1 + $0xc4] sm:$0xf] }
   0x5   :  { %v1883_v15 = vld [vmem:[%s2997_s1 + $0x1cc] sm:$0xf0]  ;;  %451 = vmatpush.bf16.msra.mxu1 %v1556_v7  ;;  %470 = vmatpush.bf16.msra.mxu2 %v1432_v8  ;;  %v1412_v16 = vor.u32 %v1851_v13, %v1411_v11  ;;  %v1413_v19 = vld [vmem:[%s2997_s1 + $0xd0] sm:$0xf0]  ;;  %v1881_v20 = vld [vmem:[%s2997_s1 + $0x1c4] sm:$0xf] }
   0x6   :  { %v1540_v17 = vor.u32 %v1883_v15, %v1539_v14  ;;  %489 = vmatpush.bf16.msra.mxu3 %v1560_v12  ;;  %v1416_v21 = vor.u32 %v1849_v18, %v1413_v19  ;;  %v1541_v22 = vld [vmem:[%s2997_s1 + $0x1d0] sm:$0xf0]  ;;  %v1395_v23 = vld [vmem:[%s2997_s1 + $0xa0] sm:$0xf]  ;;  %v1847_v24 = vld [vmem:[%s2997_s1 + $0xac] sm:$0xf0] }
   0x7   :  { %v1544_v25 = vor.u32 %v1881_v20, %v1541_v22  ;;  %v1523_v26 = vld [vmem:[%s2997_s1 + $0x1a0] sm:$0xf]  ;;  %v1879_v27 = vld [vmem:[%s2997_s1 + $0x1ac] sm:$0xf0]  ;;  %v1845_v28 = vld [vmem:[%s2997_s1 + $0xa4] sm:$0xf]  ;;  %v1396_v29 = vor.u32 %v1847_v24, %v1395_v23 }
   0x8   :  { %433 = vmatpush.bf16.msra.mxu0 %v1412_v16  ;;  %v1397_v30 = vld [vmem:[%s2997_s1 + $0xb0] sm:$0xf0]  ;;  %v1877_v31 = vld [vmem:[%s2997_s1 + $0x1a4] sm:$0xf]  ;;  %v1524_v33 = vor.u32 %v1879_v27, %v1523_v26  ;;  %v1379_v35 = vld [vmem:[%s2997_s1 + $0x80] sm:$0xf] }
   0x9   :  { %v1525_v32 = vld [vmem:[%s2997_s1 + $0x1b0] sm:$0xf0]  ;;  %452 = vmatpush.bf16.msra.mxu1 %v1540_v17  ;;  %471 = vmatpush.bf16.msra.mxu2 %v1416_v21  ;;  %v1400_v34 = vor.u32 %v1845_v28, %v1397_v30  ;;  %v1843_v36 = vld [vmem:[%s2997_s1 + $0x8c] sm:$0xf0]  ;;  %v1507_v37 = vld [vmem:[%s2997_s1 + $0x180] sm:$0xf] }
   0xa   :  { %490 = vmatpush.bf16.msra.mxu3 %v1544_v25  ;;  %v1528_v38 = vor.u32 %v1877_v31, %v1525_v32  ;;  %v1875_v39 = vld [vmem:[%s2997_s1 + $0x18c] sm:$0xf0]  ;;  %v1841_v40 = vld [vmem:[%s2997_s1 + $0x84] sm:$0xf]  ;;  %v1381_v41 = vld [vmem:[%s2997_s1 + $0x90] sm:$0xf0]  ;;  %v1380_v44 = vor.u32 %v1843_v36, %v1379_v35 }
   0xb   :  { %v1873_v42 = vld [vmem:[%s2997_s1 + $0x184] sm:$0xf]  ;;  %v1509_v43 = vld [vmem:[%s2997_s1 + $0x190] sm:$0xf0]  ;;  %v1508_v45 = vor.u32 %v1875_v39, %v1507_v37  ;;  %v1384_v46 = vor.u32 %v1841_v40, %v1381_v41  ;;  %v1363_v47 = vld [vmem:[%s2997_s1 + $0x60] sm:$0xf] }
   0xc   :  { %434 = vmatpush.bf16.msra.mxu0 %v1396_v29  ;;  %v1839_v48 = vld [vmem:[%s2997_s1 + $0x6c] sm:$0xf0]  ;;  %v1491_v49 = vld [vmem:[%s2997_s1 + $0x160] sm:$0xf]  ;;  %v1512_v50 = vor.u32 %v1873_v42, %v1509_v43  ;;  %v1837_v52 = vld [vmem:[%s2997_s1 + $0x64] sm:$0xf] }
   0xd   :  { %453 = vmatpush.bf16.msra.mxu1 %v1524_v33  ;;  %472 = vmatpush.bf16.msra.mxu2 %v1400_v34  ;;  %v1871_v51 = vld [vmem:[%s2997_s1 + $0x16c] sm:$0xf0]  ;;  %v1365_v53 = vld [vmem:[%s2997_s1 + $0x70] sm:$0xf0]  ;;  %v1869_v54 = vld [vmem:[%s2997_s1 + $0x164] sm:$0xf]  ;;  %v1364_v56 = vor.u32 %v1839_v48, %v1363_v47 }
   0xe   :  { %491 = vmatpush.bf16.msra.mxu3 %v1528_v38  ;;  %v1493_v55 = vld [vmem:[%s2997_s1 + $0x170] sm:$0xf0]  ;;  %v1492_v57 = vor.u32 %v1871_v51, %v1491_v49  ;;  %v1368_v58 = vor.u32 %v1837_v52, %v1365_v53  ;;  %v1347_v59 = vld [vmem:[%s2997_s1 + $0x40] sm:$0xf]  ;;  %v1835_v60 = vld [vmem:[%s2997_s1 + $0x4c] sm:$0xf0] }
   0xf   :  { %v1475_v61 = vld [vmem:[%s2997_s1 + $0x140] sm:$0xf]  ;;  %v1496_v62 = vor.u32 %v1869_v54, %v1493_v55  ;;  %v1867_v63 = vld [vmem:[%s2997_s1 + $0x14c] sm:$0xf0]  ;;  %v1833_v0 = vld [vmem:[%s2997_s1 + $0x44] sm:$0xf]  ;;  %v1348_v4 = vor.u32 %v1835_v60, %v1347_v59 }
  0x10   :  { %435 = vmatpush.bf16.msra.mxu0 %v1380_v44  ;;  %v1349_v1 = vld [vmem:[%s2997_s1 + $0x50] sm:$0xf0]  ;;  %v1865_v2 = vld [vmem:[%s2997_s1 + $0x144] sm:$0xf]  ;;  %v1476_v5 = vor.u32 %v1867_v63, %v1475_v61  ;;  %v1331_v7 = vld [vmem:[%s2997_s1 + $0x20] sm:$0xf] }
  0x11   :  { %454 = vmatpush.bf16.msra.mxu1 %v1508_v45  ;;  %473 = vmatpush.bf16.msra.mxu2 %v1384_v46  ;;  %v1477_v3 = vld [vmem:[%s2997_s1 + $0x150] sm:$0xf0]  ;;  %v1352_v6 = vor.u32 %v1833_v0, %v1349_v1  ;;  %v1831_v8 = vld [vmem:[%s2997_s1 + $0x2c] sm:$0xf0]  ;;  %v1459_v9 = vld [vmem:[%s2997_s1 + $0x120] sm:$0xf] }
  0x12   :  { %492 = vmatpush.bf16.msra.mxu3 %v1512_v50  ;;  %v1480_v10 = vor.u32 %v1865_v2, %v1477_v3  ;;  %v1863_v11 = vld [vmem:[%s2997_s1 + $0x12c] sm:$0xf0]  ;;  %v1829_v12 = vld [vmem:[%s2997_s1 + $0x24] sm:$0xf]  ;;  %v1333_v13 = vld [vmem:[%s2997_s1 + $0x30] sm:$0xf0]  ;;  %v1332_v16 = vor.u32 %v1831_v8, %v1331_v7 }
  0x13   :  { %v1861_v14 = vld [vmem:[%s2997_s1 + $0x124] sm:$0xf]  ;;  %v1461_v15 = vld [vmem:[%s2997_s1 + $0x130] sm:$0xf0]  ;;  %v1315_v17 = vld [vmem:[%s2997_s1] sm:$0xf]  ;;  %v1460_v19 = vor.u32 %v1863_v11, %v1459_v9  ;;  %v1336_v20 = vor.u32 %v1829_v12, %v1333_v13 }
  0x14   :  { %436 = vmatpush.bf16.msra.mxu0 %v1364_v56  ;;  %v1827_v18 = vld [vmem:[%s2997_s1 + $0xc] sm:$0xf0]  ;;  %v1443_v21 = vld [vmem:[%s2997_s1 + $0x100] sm:$0xf]  ;;  %v1825_v23 = vld [vmem:[%s2997_s1 + $0x4] sm:$0xf]  ;;  %v1464_v24 = vor.u32 %v1861_v14, %v1461_v15 }
  0x15   :  { %455 = vmatpush.bf16.msra.mxu1 %v1492_v57  ;;  %474 = vmatpush.bf16.msra.mxu2 %v1368_v58  ;;  %v1859_v22 = vld [vmem:[%s2997_s1 + $0x10c] sm:$0xf0]  ;;  %v1317_v25 = vld [vmem:[%s2997_s1 + $0x10] sm:$0xf0]  ;;  %v1857_v26 = vld [vmem:[%s2997_s1 + $0x104] sm:$0xf]  ;;  %v1316_v31 = vor.u32 %v1827_v18, %v1315_v17 }
  0x16   :  { %493 = vmatpush.bf16.msra.mxu3 %v1496_v62  ;;  %v1445_v27 = vld [vmem:[%s2997_s1 + $0x110] sm:$0xf0]  ;;  %v26_v28 = vld [vmem:[%s2998_s0] sm:$0xff]  ;;  %v1854_v29 = vld [vmem:[%s2997_s1 + $0xec] sm:$0xf]  ;;  %v1444_v35 = vor.u32 %v1859_v22, %v1443_v21  ;;  %v1320_v36 = vor.u32 %v1825_v23, %v1317_v25 }
  0x17   :  { %v1437_v30 = vld [vmem:[%s2997_s1 + $0xf8] sm:$0xf0]  ;;  %v28_v32 = vld [vmem:[%s2998_s0 + $0x10] sm:$0xff]  ;;  %v1563_v33 = vld [vmem:[%s2997_s1 + $0x1e8] sm:$0xf]  ;;  %v1448_v39 = vor.u32 %v1857_v26, %v1445_v27 }
  0x18   :  { %437 = vmatpush.bf16.msra.mxu0 %v1348_v4  ;;  %v1888_v34 = vld [vmem:[%s2997_s1 + $0x1f4] sm:$0xf0]  ;;  %v27_v37 = vld [vmem:[%s2998_s0 + $0x8] sm:$0xff]  ;;  %v1440_v40 = vor.u32 %v1854_v29, %v1437_v30  ;;  %v2238_v44 = vpack.c.bf16 %v28_v32, %v26_v28  ;;  %v1565_v46 = vld [vmem:[%s2997_s1 + $0x1f8] sm:$0xf0] }
  0x19   :  { %456 = vmatpush.bf16.msra.mxu1 %v1476_v5  ;;  %475 = vmatpush.bf16.msra.mxu2 %v1352_v6  ;;  %v29_v38 = vld [vmem:[%s2998_s0 + $0x18] sm:$0xff]  ;;  %v1435_v41 = vld [vmem:[%s2997_s1 + $0xe8] sm:$0xf]  ;;  %v1886_v43 = vld [vmem:[%s2997_s1 + $0x1ec] sm:$0xf]  ;;  %v1564_v45 = vor.u32 %v1888_v34, %v1563_v33 }
  0x1a   :  { %494 = vmatpush.bf16.msra.mxu3 %v1480_v10  ;;  %v1856_v42 = vld [vmem:[%s2997_s1 + $0xf4] sm:$0xf0]  ;;  %v1850_v47 = vld [vmem:[%s2997_s1 + $0xcc] sm:$0xf]  ;;  %v1421_v48 = vld [vmem:[%s2997_s1 + $0xd8] sm:$0xf0]  ;;  %v2249_v49 = vpack.c.bf16 %v29_v38, %v27_v37  ;;  %v1568_v53 = vor.u32 %v1886_v43, %v1565_v46 }
  0x1b   :  { %v1547_v50 = vld [vmem:[%s2997_s1 + $0x1c8] sm:$0xf]  ;;  %v1884_v51 = vld [vmem:[%s2997_s1 + $0x1d4] sm:$0xf0]  ;;  %v1436_v52 = vor.u32 %v1856_v42, %v1435_v41  ;;  %v1424_v54 = vor.u32 %v1850_v47, %v1421_v48  ;;  %v1882_v57 = vld [vmem:[%s2997_s1 + $0x1cc] sm:$0xf] }
  0x1c   :  { %438 = vmatpush.bf16.msra.mxu0 %v1332_v16  ;;  %v1419_v55 = vld [vmem:[%s2997_s1 + $0xc8] sm:$0xf]  ;;  %v1852_v56 = vld [vmem:[%s2997_s1 + $0xd4] sm:$0xf0]  ;;  %v1548_v58 = vor.u32 %v1884_v51, %v1547_v50  ;;  %v1549_v59 = vld [vmem:[%s2997_s1 + $0x1d8] sm:$0xf0] }
  0x1d   :  { %457 = vmatpush.bf16.msra.mxu1 %v1460_v19  ;;  %476 = vmatpush.bf16.msra.mxu2 %v1336_v20  ;;  %v1846_v60 = vld [vmem:[%s2997_s1 + $0xac] sm:$0xf]  ;;  %v1405_v61 = vld [vmem:[%s2997_s1 + $0xb8] sm:$0xf0]  ;;  %v1531_v62 = vld [vmem:[%s2997_s1 + $0x1a8] sm:$0xf]  ;;  %v1420_v0 = vor.u32 %v1852_v56, %v1419_v55  ;;  %v1552_v1 = vor.u32 %v1882_v57, %v1549_v59 }
  0x1e   :  { %495 = vmatpush.bf16.msra.mxu3 %v1464_v24  ;;  %v1880_v63 = vld [vmem:[%s2997_s1 + $0x1b4] sm:$0xf0]  ;;  %v1408_v2 = vor.u32 %v1846_v60, %v1405_v61  ;;  %v1403_v3 = vld [vmem:[%s2997_s1 + $0xa8] sm:$0xf]  ;;  %v1878_v5 = vld [vmem:[%s2997_s1 + $0x1ac] sm:$0xf] }
  0x1f   :  { %v1848_v4 = vld [vmem:[%s2997_s1 + $0xb4] sm:$0xf0]  ;;  %v1532_v6 = vor.u32 %v1880_v63, %v1531_v62  ;;  %v1533_v7 = vld [vmem:[%s2997_s1 + $0x1b8] sm:$0xf0]  ;;  %v1842_v8 = vld [vmem:[%s2997_s1 + $0x8c] sm:$0xf] }
  0x20   :  { %439 = vmatpush.bf16.msra.mxu0 %v1316_v31  ;;  %v1389_v9 = vld [vmem:[%s2997_s1 + $0x98] sm:$0xf0]  ;;  %v1515_v10 = vld [vmem:[%s2997_s1 + $0x188] sm:$0xf]  ;;  %v1876_v11 = vld [vmem:[%s2997_s1 + $0x194] sm:$0xf0]  ;;  %v1404_v12 = vor.u32 %v1848_v4, %v1403_v3  ;;  %v1536_v14 = vor.u32 %v1878_v5, %v1533_v7 }
  0x21   :  { %458 = vmatpush.bf16.msra.mxu1 %v1444_v35  ;;  %477 = vmatpush.bf16.msra.mxu2 %v1320_v36  ;;  %v1387_v13 = vld [vmem:[%s2997_s1 + $0x88] sm:$0xf]  ;;  %v1392_v15 = vor.u32 %v1842_v8, %v1389_v9  ;;  %v1844_v16 = vld [vmem:[%s2997_s1 + $0x94] sm:$0xf0]  ;;  %v1874_v17 = vld [vmem:[%s2997_s1 + $0x18c] sm:$0xf]  ;;  %v1516_v19 = vor.u32 %v1876_v11, %v1515_v10 }
  0x22   :  { %496 = vmatpush.bf16.msra.mxu3 %v1448_v39  ;;  %v1517_v18 = vld [vmem:[%s2997_s1 + $0x198] sm:$0xf0]  ;;  %v30_v20 = vld [vmem:[%s2998_s0 + $0x20] sm:$0xff]  ;;  %v1838_v21 = vld [vmem:[%s2997_s1 + $0x6c] sm:$0xf]  ;;  %v1388_v26 = vor.u32 %v1844_v16, %v1387_v13 }
  0x23   :  { %440 = vmatmul.bf16.vlgmr.msra.gmra.mxu0 %v2238_v44  ;;  %v1373_v22 = vld [vmem:[%s2997_s1 + $0x78] sm:$0xf0]  ;;  %v32_v23 = vld [vmem:[%s2998_s0 + $0x30] sm:$0xff]  ;;  %v1499_v24 = vld [vmem:[%s2997_s1 + $0x168] sm:$0xf]  ;;  %v1520_v29 = vor.u32 %v1874_v17, %v1517_v18 }
  0x24   :  { %459 = vmatmul.bf16.vlgmr.msra.gmra.mxu1 %v2249_v49  ;;  %478 = vmatmul.bf16.vlgmr.msra.gmra.mxu2 %v2238_v44  ;;  %v1872_v25 = vld [vmem:[%s2997_s1 + $0x174] sm:$0xf0]  ;;  %v31_v27 = vld [vmem:[%s2998_s0 + $0x28] sm:$0xff]  ;;  %v1376_v30 = vor.u32 %v1838_v21, %v1373_v22  ;;  %v2354_v34 = vpack.c.bf16 %v32_v23, %v30_v20  ;;  %v1501_v36 = vld [vmem:[%s2997_s1 + $0x178] sm:$0xf0] }
  0x25   :  { %546 = vmatpush.bf16.msrb.mxu2 %v1440_v40  ;;  %527 = vmatpush.bf16.msrb.mxu1 %v1564_v45  ;;  %v33_v28 = vld [vmem:[%s2998_s0 + $0x38] sm:$0xff]  ;;  %v1371_v31 = vld [vmem:[%s2997_s1 + $0x68] sm:$0xf]  ;;  %v1870_v33 = vld [vmem:[%s2997_s1 + $0x16c] sm:$0xf]  ;;  %v1500_v35 = vor.u32 %v1872_v25, %v1499_v24 }
  0x26   :  { %497 = vmatmul.bf16.vlgmr.msra.gmra.mxu3 %v2249_v49  ;;  %508 = vmatpush.bf16.msrb.mxu0 %v1436_v52  ;;  %v1840_v32 = vld [vmem:[%s2997_s1 + $0x74] sm:$0xf0]  ;;  %v1834_v37 = vld [vmem:[%s2997_s1 + $0x4c] sm:$0xf]  ;;  %v1357_v38 = vld [vmem:[%s2997_s1 + $0x58] sm:$0xf0]  ;;  %v2365_v39 = vpack.c.bf16 %v33_v28, %v31_v27  ;;  %v1504_v43 = vor.u32 %v1870_v33, %v1501_v36 }
  0x27   :  { %565 = vmatpush.bf16.msrb.mxu3 %v1568_v53  ;;  %v1483_v40 = vld [vmem:[%s2997_s1 + $0x148] sm:$0xf]  ;;  %v1868_v41 = vld [vmem:[%s2997_s1 + $0x154] sm:$0xf0]  ;;  %v1372_v42 = vor.u32 %v1840_v32, %v1371_v31  ;;  %v1360_v45 = vor.u32 %v1834_v37, %v1357_v38  ;;  %v1866_v48 = vld [vmem:[%s2997_s1 + $0x14c] sm:$0xf] }
  0x28   :  { %v1355_v46 = vld [vmem:[%s2997_s1 + $0x48] sm:$0xf]  ;;  %v1836_v47 = vld [vmem:[%s2997_s1 + $0x54] sm:$0xf0]  ;;  %v1484_v50 = vor.u32 %v1868_v41, %v1483_v40  ;;  %v1485_v51 = vld [vmem:[%s2997_s1 + $0x158] sm:$0xf0] }
  0x29   :  { %547 = vmatpush.bf16.msrb.mxu2 %v1424_v54  ;;  %528 = vmatpush.bf16.msrb.mxu1 %v1548_v58  ;;  %v1830_v52 = vld [vmem:[%s2997_s1 + $0x2c] sm:$0xf]  ;;  %v1341_v53 = vld [vmem:[%s2997_s1 + $0x38] sm:$0xf0]  ;;  %v1467_v54 = vld [vmem:[%s2997_s1 + $0x128] sm:$0xf]  ;;  %v1356_v56 = vor.u32 %v1836_v47, %v1355_v46  ;;  %v1488_v57 = vor.u32 %v1866_v48, %v1485_v51 }
  0x2a   :  { %509 = vmatpush.bf16.msrb.mxu0 %v1420_v0  ;;  %v1864_v55 = vld [vmem:[%s2997_s1 + $0x134] sm:$0xf0]  ;;  %v1344_v58 = vor.u32 %v1830_v52, %v1341_v53  ;;  %v1339_v59 = vld [vmem:[%s2997_s1 + $0x28] sm:$0xf]  ;;  %v1862_v61 = vld [vmem:[%s2997_s1 + $0x12c] sm:$0xf] }
  0x2b   :  { %566 = vmatpush.bf16.msrb.mxu3 %v1552_v1  ;;  %v1832_v60 = vld [vmem:[%s2997_s1 + $0x34] sm:$0xf0]  ;;  %v1468_v62 = vor.u32 %v1864_v55, %v1467_v54  ;;  %v1469_v63 = vld [vmem:[%s2997_s1 + $0x138] sm:$0xf0]  ;;  %v1826_v0 = vld [vmem:[%s2997_s1 + $0xc] sm:$0xf] }
  0x2c   :  { %v1325_v1 = vld [vmem:[%s2997_s1 + $0x18] sm:$0xf0]  ;;  %v1860_v3 = vld [vmem:[%s2997_s1 + $0x114] sm:$0xf0]  ;;  %v1340_v4 = vor.u32 %v1832_v60, %v1339_v59  ;;  %v1691_v5 = vld [vmem:[%s2999_s3 + $0xf0] sm:$0xf]  ;;  %v1472_v7 = vor.u32 %v1862_v61, %v1469_v63 }
  0x2d   :  { %548 = vmatpush.bf16.msrb.mxu2 %v1408_v2  ;;  %529 = vmatpush.bf16.msrb.mxu1 %v1532_v6  ;;  %v1451_v2 = vld [vmem:[%s2997_s1 + $0x108] sm:$0xf]  ;;  %v1920_v6 = vld [vmem:[%s2999_s3 + $0xf4] sm:$0xf0]  ;;  %v1328_v8 = vor.u32 %v1826_v0, %v1325_v1  ;;  %v1858_v11 = vld [vmem:[%s2997_s1 + $0x10c] sm:$0xf] }
  0x2e   :  { %510 = vmatpush.bf16.msrb.mxu0 %v1404_v12  ;;  %v1323_v9 = vld [vmem:[%s2997_s1 + $0x8] sm:$0xf]  ;;  %v1828_v10 = vld [vmem:[%s2997_s1 + $0x14] sm:$0xf0]  ;;  %v1452_v12 = vor.u32 %v1860_v3, %v1451_v2  ;;  %v1453_v13 = vld [vmem:[%s2997_s1 + $0x118] sm:$0xf0]  ;;  %v1692_v16 = vor.u32 %v1920_v6, %v1691_v5 }
  0x2f   :  { %567 = vmatpush.bf16.msrb.mxu3 %v1536_v14  ;;  %v1627_v14 = vld [vmem:[%s2999_s3 + $0x70] sm:$0xf]  ;;  %v1324_v17 = vor.u32 %v1828_v10, %v1323_v9  ;;  %v1456_v18 = vor.u32 %v1858_v11, %v1453_v13  ;;  %v1619_v20 = vld [vmem:[%s2999_s3 + $0x60] sm:$0xf]  ;;  %v1902_v21 = vld [vmem:[%s2999_s3 + $0x64] sm:$0xf0] }
  0x30   :  { %v1683_v22 = vld [vmem:[%s2999_s3 + $0xe0] sm:$0xf]  ;;  %v1918_v23 = vld [vmem:[%s2999_s3 + $0xe4] sm:$0xf0]  ;;  %v1620_v24 = vor.u32 %v1902_v21, %v1619_v20  ;;  %v1900_v27 = vld [vmem:[%s2999_s3 + $0x54] sm:$0xf0] }
  0x31   :  { %549 = vmatpush.bf16.msrb.mxu2 %v1392_v15  ;;  %530 = vmatpush.bf16.msrb.mxu1 %v1516_v19  ;;  %v1904_v15 = vld [vmem:[%s2999_s3 + $0x74] sm:$0xf0]  ;;  %v1684_v25 = vor.u32 %v1918_v23, %v1683_v22  ;;  %v1595_v33 = vld [vmem:[%s2999_s3 + $0x30] sm:$0xf]  ;;  %v1667_v36 = vld [vmem:[%s2999_s3 + $0xc0] sm:$0xf] }
  0x32   :  { %511 = vmatpush.bf16.msrb.mxu0 %v1388_v26  ;;  %v1628_v19 = vor.u32 %v1904_v15, %v1627_v14  ;;  %v1611_v26 = vld [vmem:[%s2999_s3 + $0x50] sm:$0xf]  ;;  %v1914_v37 = vld [vmem:[%s2999_s3 + $0xc4] sm:$0xf0]  ;;  %v1892_v47 = vld [vmem:[%s2999_s3 + $0x14] sm:$0xf0] }
  0x33   :  { %568 = vmatpush.bf16.msrb.mxu3 %v1520_v29  ;;  %445 = vmatmul.bf16.gmra.mxu0 %v2354_v34  ;;  %v1612_v28 = vor.u32 %v1900_v27, %v1611_v26  ;;  %v1603_v29 = vld [vmem:[%s2999_s3 + $0x40] sm:$0xf]  ;;  %v1668_v38 = vor.u32 %v1914_v37, %v1667_v36  ;;  %v1894_v40 = vld [vmem:[%s2999_s3 + $0x24] sm:$0xf0]  ;;  %v1579_v46 = vld [vmem:[%s2999_s3 + $0x10] sm:$0xf] }
  0x34   :  { %464 = vmatmul.bf16.gmra.mxu1 %v2365_v39  ;;  %483 = vmatmul.bf16.gmra.mxu2 %v2354_v34  ;;  %v1580_v48 = vor.u32 %v1892_v47, %v1579_v46  ;;  %v1910_v51 = vld [vmem:[%s2999_s3 + $0xa4] sm:$0xf0]  ;;  %v1571_v53 = vld [vmem:[%s2999_s3] sm:$0xf]  ;;  %v1755_v59 = vld [vmem:[%s2999_s3 + $0x170] sm:$0xf] }
  0x35   :  { %550 = vmatpush.bf16.msrb.mxu2 %v1376_v30  ;;  %531 = vmatpush.bf16.msrb.mxu1 %v1500_v35  ;;  %v1898_v30 = vld [vmem:[%s2999_s3 + $0x44] sm:$0xf0]  ;;  %v1896_v35 = vld [vmem:[%s2999_s3 + $0x34] sm:$0xf0]  ;;  %v1903_v61 = vld [vmem:[%s2999_s3 + $0x74] sm:$0xf] }
  0x36   :  { %502 = vmatmul.bf16.gmra.mxu3 %v2365_v39  ;;  %512 = vmatpush.bf16.msrb.mxu0 %v1372_v42  ;;  %v1604_v31 = vor.u32 %v1898_v30, %v1603_v29  ;;  %v1659_v42 = vld [vmem:[%s2999_s3 + $0xb0] sm:$0xf]  ;;  %v1890_v54 = vld [vmem:[%s2999_s3 + $0x4] sm:$0xf0]  ;;  %v1936_v60 = vld [vmem:[%s2999_s3 + $0x174] sm:$0xf0] }
  0x37   :  { %569 = vmatpush.bf16.msrb.mxu3 %v1504_v43  ;;  %v1912_v43 = vld [vmem:[%s2999_s3 + $0xb4] sm:$0xf0]  ;;  %v1572_v55 = vor.u32 %v1890_v54, %v1571_v53  ;;  %v1629_v63 = vld [vmem:[%s2999_s3 + $0x78] sm:$0xf0]  ;;  %v1635_v1 = vld [vmem:[%s2999_s3 + $0x80] sm:$0xf] }
  0x38   :  { %v1632_v0 = vor.u32 %v1903_v61, %v1629_v63  ;;  %v1906_v2 = vld [vmem:[%s2999_s3 + $0x84] sm:$0xf0]  ;;  %v1901_v6 = vld [vmem:[%s2999_s3 + $0x64] sm:$0xf]  ;;  %v1819_v10 = vld [vmem:[%s2999_s3 + $0x1f0] sm:$0xf] }
  0x39   :  { %551 = vmatpush.bf16.msrb.mxu2 %v1360_v45  ;;  %532 = vmatpush.bf16.msrb.mxu1 %v1484_v50  ;;  %v1660_v45 = vor.u32 %v1912_v43, %v1659_v42  ;;  %v1651_v50 = vld [vmem:[%s2999_s3 + $0xa0] sm:$0xf]  ;;  %v1636_v3 = vor.u32 %v1906_v2, %v1635_v1  ;;  %v1934_v5 = vld [vmem:[%s2999_s3 + $0x164] sm:$0xf0]  ;;  %v1952_v11 = vld [vmem:[%s2999_s3 + $0x1f4] sm:$0xf0] }
  0x3a   :  { %513 = vmatpush.bf16.msrb.mxu0 %v1356_v56  ;;  %v1652_v52 = vor.u32 %v1910_v51, %v1651_v50  ;;  %v1643_v56 = vld [vmem:[%s2999_s3 + $0x90] sm:$0xf]  ;;  %v1820_v13 = vor.u32 %v1952_v11, %v1819_v10  ;;  %v1693_v14 = vld [vmem:[%s2999_s3 + $0xf8] sm:$0xf0]  ;;  %v1811_v22 = vld [vmem:[%s2999_s3 + $0x1e0] sm:$0xf] }
  0x3b   :  { %570 = vmatpush.bf16.msrb.mxu3 %v1488_v57  ;;  %v1908_v57 = vld [vmem:[%s2999_s3 + $0x94] sm:$0xf0]  ;;  %v1613_v20 = vld [vmem:[%s2999_s3 + $0x58] sm:$0xf0]  ;;  %v1950_v23 = vld [vmem:[%s2999_s3 + $0x1e4] sm:$0xf0] }
  0x3c   :  { %v1812_v26 = vor.u32 %v1950_v23, %v1811_v22  ;;  %v1685_v27 = vld [vmem:[%s2999_s3 + $0xe8] sm:$0xf0]  ;;  %v1731_v29 = vld [vmem:[%s2999_s3 + $0x140] sm:$0xf]  ;;  %v1930_v30 = vld [vmem:[%s2999_s3 + $0x144] sm:$0xf0] }
  0x3d   :  { %552 = vmatpush.bf16.msrb.mxu2 %v1344_v58  ;;  %533 = vmatpush.bf16.msrb.mxu1 %v1468_v62  ;;  %v1644_v58 = vor.u32 %v1908_v57, %v1643_v56  ;;  %v1756_v62 = vor.u32 %v1936_v60, %v1755_v59  ;;  %v1723_v42 = vld [vmem:[%s2999_s3 + $0x130] sm:$0xf]  ;;  %v1928_v43 = vld [vmem:[%s2999_s3 + $0x134] sm:$0xf0]  ;;  %v1597_v47 = vld [vmem:[%s2999_s3 + $0x38] sm:$0xf0] }
  0x3e   :  { %514 = vmatpush.bf16.msrb.mxu0 %v1340_v4  ;;  %v1747_v4 = vld [vmem:[%s2999_s3 + $0x160] sm:$0xf]  ;;  %v1724_v46 = vor.u32 %v1928_v43, %v1723_v42  ;;  %v1946_v51 = vld [vmem:[%s2999_s3 + $0x1c4] sm:$0xf0]  ;;  %v1669_v54 = vld [vmem:[%s2999_s3 + $0xc8] sm:$0xf0] }
  0x3f   :  { %571 = vmatpush.bf16.msrb.mxu3 %v1472_v7  ;;  %v1748_v7 = vor.u32 %v1934_v5, %v1747_v4  ;;  %v1795_v50 = vld [vmem:[%s2999_s3 + $0x1c0] sm:$0xf]  ;;  %v1893_v60 = vld [vmem:[%s2999_s3 + $0x24] sm:$0xf]  ;;  %v1589_v61 = vld [vmem:[%s2999_s3 + $0x28] sm:$0xf0] }
  0x40   :  { %v1796_v53 = vor.u32 %v1946_v51, %v1795_v50  ;;  %v1715_v57 = vld [vmem:[%s2999_s3 + $0x120] sm:$0xf]  ;;  %v1592_v63 = vor.u32 %v1893_v60, %v1589_v61  ;;  %v1944_v1 = vld [vmem:[%s2999_s3 + $0x1b4] sm:$0xf0]  ;;  %v1911_v2 = vld [vmem:[%s2999_s3 + $0xb4] sm:$0xf] }
  0x41   :  { %553 = vmatpush.bf16.msrb.mxu2 %v1328_v8  ;;  %534 = vmatpush.bf16.msrb.mxu1 %v1452_v12  ;;  %v1621_v8 = vld [vmem:[%s2999_s3 + $0x68] sm:$0xf0]  ;;  %v1919_v12 = vld [vmem:[%s2999_s3 + $0xf4] sm:$0xf]  ;;  %v1757_v50 = vld [vmem:[%s2999_s3 + $0x178] sm:$0xf0] }
  0x42   :  { %515 = vmatpush.bf16.msrb.mxu0 %v1324_v17  ;;  %v1624_v9 = vor.u32 %v1901_v6, %v1621_v8  ;;  %v1696_v15 = vor.u32 %v1919_v12, %v1693_v14  ;;  %v1932_v17 = vld [vmem:[%s2999_s3 + $0x154] sm:$0xf0]  ;;  %v1707_v12 = vld [vmem:[%s2999_s3 + $0x110] sm:$0xf]  ;;  %v1891_v14 = vld [vmem:[%s2999_s3 + $0x14] sm:$0xf] }
  0x43   :  { %572 = vmatpush.bf16.msrb.mxu3 %v1456_v18  ;;  %v1899_v18 = vld [vmem:[%s2999_s3 + $0x54] sm:$0xf] }
  0x44   :  { %535 = vmatmul.bf16.vlgmr.msrb.gmra.mxu1 %v2249_v49  ;;  %554 = vmatmul.bf16.vlgmr.msrb.gmra.mxu2 %v2238_v44  ;;  %v1616_v21 = vor.u32 %v1899_v18, %v1613_v20  ;;  %v1942_v20 = vld [vmem:[%s2999_s3 + $0x1a4] sm:$0xf0] }
  0x45   :  { %1011 = vmatpush.bf16.msra.mxu1 %v1692_v16  ;;  %516 = vmatmul.bf16.vlgmr.msrb.gmra.mxu0 %v2238_v44  ;;  %v1675_v44 = vld [vmem:[%s2999_s3 + $0xd0] sm:$0xf] }
  0x46   :  { %992 = vmatpush.bf16.msra.mxu0 %v1628_v19  ;;  %573 = vmatmul.bf16.vlgmr.msrb.gmra.mxu3 %v2249_v49  ;;  %v1916_v49 = vld [vmem:[%s2999_s3 + $0xd4] sm:$0xf0]  ;;  %v1739_v16 = vld [vmem:[%s2999_s3 + $0x150] sm:$0xf] }
  0x47   :  { %v1676_v32 = vor.u32 %v1916_v49, %v1675_v44  ;;  %1030 = vmatpush.bf16.msra.mxu2 %v1756_v62  ;;  %1049 = vmatpush.bf16.msra.mxu3 %v1820_v13  ;;  %v1740_v19 = vor.u32 %v1932_v17, %v1739_v16  ;;  %v1732_v44 = vor.u32 %v1930_v30, %v1731_v29  ;;  %v1605_v49 = vld [vmem:[%s2999_s3 + $0x48] sm:$0xf0]  ;;  %v1924_v13 = vld [vmem:[%s2999_s3 + $0x114] sm:$0xf0]  ;;  %v1581_v16 = vld [vmem:[%s2999_s3 + $0x18] sm:$0xf0] }
  0x48   :  { %v1584_v18 = vor.u32 %v1891_v14, %v1581_v16  ;;  %v1699_v29 = vld [vmem:[%s2999_s3 + $0x100] sm:$0xf]  ;;  %v1922_v30 = vld [vmem:[%s2999_s3 + $0x104] sm:$0xf0]  ;;  %v1949_v16 = vld [vmem:[%s2999_s3 + $0x1e4] sm:$0xf] }
  0x49   :  { %1012 = vmatpush.bf16.msra.mxu1 %v1684_v25  ;;  %v2601_v25 = vld [vmem:[%s3000_s2] sm:$0xf] }
  0x4a   :  { %993 = vmatpush.bf16.msra.mxu0 %v1620_v24  ;;  %v1917_v24 = vld [vmem:[%s2999_s3 + $0xe4] sm:$0xf]  ;;  %v2628_v36 = vperm.slane %v2601_v25, 0 }
  0x4b   :  { %1031 = vmatpush.bf16.msra.mxu2 %v1748_v7  ;;  %1050 = vmatpush.bf16.msra.mxu3 %v1812_v26  ;;  %v1661_v7 = vld [vmem:[%s2999_s3 + $0xb8] sm:$0xf0] }
  0x4c   :  { %v1664_v11 = vor.u32 %v1911_v2, %v1661_v7 }
  0x4d   :  { %1013 = vmatpush.bf16.msra.mxu1 %v1676_v32 }
  0x4e   :  { %994 = vmatpush.bf16.msra.mxu0 %v1612_v28  ;;  %v1688_v28 = vor.u32 %v1917_v24, %v1685_v27  ;;  %v1653_v24 = vld [vmem:[%s2999_s3 + $0xa8] sm:$0xf0] }
  0x4f   :  { %1032 = vmatpush.bf16.msra.mxu2 %v1740_v19  ;;  %v1779_v19 = vld [vmem:[%s2999_s3 + $0x1a0] sm:$0xf] }
  0x50   :  { %v1780_v23 = vor.u32 %v1942_v20, %v1779_v19 }
  0x51   :  { %1014 = vmatpush.bf16.msra.mxu1 %v1668_v38 }
  0x52   :  { %995 = vmatpush.bf16.msra.mxu0 %v1604_v31  ;;  %v1897_v31 = vld [vmem:[%s2999_s3 + $0x44] sm:$0xf] }
  0x53   :  { %v1608_v32 = vor.u32 %v1897_v31, %v1605_v49  ;;  %1033 = vmatpush.bf16.msra.mxu2 %v1732_v44  ;;  %v1700_v31 = vor.u32 %v1922_v30, %v1699_v29  ;;  %v1889_v44 = vld [vmem:[%s2999_s3 + $0x4] sm:$0xf]  ;;  %v1573_v49 = vld [vmem:[%s2999_s3 + $0x8] sm:$0xf0] }
  0x54   :  { %540 = vmatmul.bf16.gmra.mxu1 %v2365_v39  ;;  %559 = vmatmul.bf16.gmra.mxu2 %v2354_v34 }
  0x55   :  { %521 = vmatmul.bf16.gmra.mxu0 %v2354_v34  ;;  %v1596_v34 = vor.u32 %v1896_v35, %v1595_v33  ;;  %1015 = vmatpush.bf16.msra.mxu1 %v1660_v45  ;;  %v1803_v33 = vld [vmem:[%s2999_s3 + $0x1d0] sm:$0xf]  ;;  %v1948_v35 = vld [vmem:[%s2999_s3 + $0x1d4] sm:$0xf0]  ;;  %v1895_v45 = vld [vmem:[%s2999_s3 + $0x34] sm:$0xf] }
  0x56   :  { %578 = vmatmul.bf16.gmra.mxu3 %v2365_v39  ;;  %v1587_v39 = vld [vmem:[%s2999_s3 + $0x20] sm:$0xf]  ;;  %v1804_v38 = vor.u32 %v1948_v35, %v1803_v33  ;;  %v1576_v35 = vor.u32 %v1889_v44, %v1573_v49 }
  0x57   :  { %996 = vmatpush.bf16.msra.mxu0 %v1596_v34  ;;  %v1588_v41 = vor.u32 %v1894_v40, %v1587_v39  ;;  %v1915_v34 = vld [vmem:[%s2999_s3 + $0xd4] sm:$0xf]  ;;  %v1677_v39 = vld [vmem:[%s2999_s3 + $0xd8] sm:$0xf0]  ;;  %1034 = vmatpush.bf16.msra.mxu2 %v1724_v46 }
  0x58   :  { %1051 = vmatpush.bf16.msra.mxu3 %v1804_v38  ;;  %v1907_v38 = vld [vmem:[%s2999_s3 + $0x94] sm:$0xf] }
  0x59   :  { %1016 = vmatpush.bf16.msra.mxu1 %v1652_v52  ;;  %v1913_v52 = vld [vmem:[%s2999_s3 + $0xc4] sm:$0xf] }
  0x5a   :  { %v1672_v56 = vor.u32 %v1913_v52, %v1669_v54  ;;  %v1938_v54 = vld [vmem:[%s2999_s3 + $0x184] sm:$0xf0] }
  0x5b   :  { %997 = vmatpush.bf16.msra.mxu0 %v1588_v41  ;;  %v1680_v41 = vor.u32 %v1915_v34, %v1677_v39  ;;  %v1771_v34 = vld [vmem:[%s2999_s3 + $0x190] sm:$0xf] }
  0x5c   :  { %1052 = vmatpush.bf16.msra.mxu3 %v1796_v53  ;;  %v1763_v53 = vld [vmem:[%s2999_s3 + $0x180] sm:$0xf] }
  0x5d   :  { %1017 = vmatpush.bf16.msra.mxu1 %v1644_v58  ;;  %v1926_v58 = vld [vmem:[%s2999_s3 + $0x124] sm:$0xf0] }
  0x5e   :  { %v1716_v59 = vor.u32 %v1926_v58, %v1715_v57  ;;  %v1764_v58 = vor.u32 %v1938_v54, %v1763_v53  ;;  %v2834_v53 = vperm.slane %v2601_v25, 3 }
  0x5f   :  { %998 = vmatpush.bf16.msra.mxu0 %v1580_v48  ;;  %v1600_v48 = vor.u32 %v1895_v45, %v1597_v47  ;;  %v1645_v45 = vld [vmem:[%s2999_s3 + $0x98] sm:$0xf0] }
  0x60   :  { %1035 = vmatpush.bf16.msra.mxu2 %v1716_v59  ;;  %v1648_v47 = vor.u32 %v1907_v38, %v1645_v45  ;;  %v1637_v59 = vld [vmem:[%s2999_s3 + $0x88] sm:$0xf0]  ;;  %v2810_v38 = vperm.slane %v2601_v25, 2  ;;  %v1925_v45 = vld [vmem:[%s2999_s3 + $0x124] sm:$0xf] }
  0x61   :  { %1018 = vmatpush.bf16.msra.mxu1 %v1636_v3  ;;  %v2680_v3 = vperm.slane %v2601_v25, 1  ;;  %v1941_v25 = vld [vmem:[%s2999_s3 + $0x1a4] sm:$0xf] }
  0x63   :  { %999 = vmatpush.bf16.msra.mxu0 %v1572_v55 }
  0x65   :  { %1087 = vmatpush.bf16.msrb.mxu1 %v1696_v15  ;;  %v1708_v15 = vor.u32 %v1924_v13, %v1707_v12  ;;  %v1931_v12 = vld [vmem:[%s2999_s3 + $0x154] sm:$0xf]  ;;  %v1741_v13 = vld [vmem:[%s2999_s3 + $0x158] sm:$0xf0] }
  0x66   :  { %v1744_v14 = vor.u32 %v1931_v12, %v1741_v13 }
  0x67   :  { %1068 = vmatpush.bf16.msrb.mxu0 %v1632_v0  ;;  %v1787_v0 = vld [vmem:[%s2999_s3 + $0x1b0] sm:$0xf]  ;;  %1036 = vmatpush.bf16.msra.mxu2 %v1708_v15 }
  0x68   :  { %v1788_v6 = vor.u32 %v1944_v1, %v1787_v0 }
  0x69   :  { %1088 = vmatpush.bf16.msrb.mxu1 %v1688_v28 }
  0x6a   :  { %1053 = vmatpush.bf16.msra.mxu3 %v1788_v6 }
  0x6b   :  { %1069 = vmatpush.bf16.msrb.mxu0 %v1624_v9  ;;  %1037 = vmatpush.bf16.msra.mxu2 %v1700_v31 }
  0x6d   :  { %1089 = vmatpush.bf16.msrb.mxu1 %v1680_v41 }
  0x6e   :  { %1054 = vmatpush.bf16.msra.mxu3 %v1780_v23 }
  0x6f   :  { %1070 = vmatpush.bf16.msrb.mxu0 %v1616_v21  ;;  %v1909_v21 = vld [vmem:[%s2999_s3 + $0xa4] sm:$0xf] }
  0x70   :  { %v1656_v28 = vor.u32 %v1909_v21, %v1653_v24  ;;  %v1929_v21 = vld [vmem:[%s2999_s3 + $0x144] sm:$0xf] }
  0x71   :  { %1090 = vmatpush.bf16.msrb.mxu1 %v1672_v56 }
  0x73   :  { %1071 = vmatpush.bf16.msrb.mxu0 %v1608_v32 }
  0x75   :  { %1091 = vmatpush.bf16.msrb.mxu1 %v1664_v11 }
  0x77   :  { %1072 = vmatpush.bf16.msrb.mxu0 %v1600_v48  ;;  %v1935_v48 = vld [vmem:[%s2999_s3 + $0x174] sm:$0xf] }
  0x78   :  { %v1760_v52 = vor.u32 %v1935_v48, %v1757_v50 }
  0x79   :  { %1092 = vmatpush.bf16.msrb.mxu1 %v1656_v28  ;;  %v1805_v28 = vld [vmem:[%s2999_s3 + $0x1d8] sm:$0xf0] }
  0x7a   :  { %1106 = vmatpush.bf16.msrb.mxu2 %v1760_v52  ;;  %v1789_v52 = vld [vmem:[%s2999_s3 + $0x1b8] sm:$0xf0] }
  0x7b   :  { %1073 = vmatpush.bf16.msrb.mxu0 %v1592_v63  ;;  %v1749_v63 = vld [vmem:[%s2999_s3 + $0x168] sm:$0xf0] }
  0x7d   :  { %1093 = vmatpush.bf16.msrb.mxu1 %v1648_v47 }
  0x7f   :  { %1074 = vmatpush.bf16.msrb.mxu0 %v1584_v18 }
  0x83   :  { %1075 = vmatpush.bf16.msrb.mxu0 %v1576_v35  ;;  %v1927_v35 = vld [vmem:[%s2999_s3 + $0x134] sm:$0xf] }
  0xa0   :  { %v441_v37 = vpop.f32.mrf.mxu0 }
  0xa1   :  { %v460_v40 = vpop.f32.mrf.mxu1  ;;  %v442_v55 = vadd.f32 %v441_v37, %v2628_v36  ;;  %v1940_v37 = vld [vmem:[%s2999_s3 + $0x194] sm:$0xf0] }
  0xa2   :  { %v1772_v43 = vor.u32 %v1940_v37, %v1771_v34  ;;  %v1725_v34 = vld [vmem:[%s2999_s3 + $0x138] sm:$0xf0] }
  0xa3   :  { %v461_v8 = vadd.f32 %v460_v40, %v442_v55  ;;  %v1905_v55 = vld [vmem:[%s2999_s3 + $0x84] sm:$0xf] }
  0xa4   :  { %1055 = vmatpush.bf16.msra.mxu3 %v1772_v43  ;;  %v1640_v61 = vor.u32 %v1905_v55, %v1637_v59  ;;  %v1923_v59 = vld [vmem:[%s2999_s3 + $0x114] sm:$0xf] }
  0xa5   :  { %v584_v26 = vmax.f32 %v461_v8, 0.0 }
  0xa6   :  { %1094 = vmatpush.bf16.msrb.mxu1 %v1640_v61 }
  0xa7   :  { %v479_v62 = vpop.f32.mrf.mxu2 }
  0xa8   :  { %v443_v5 = vpop.f32.mrf.mxu0  ;;  %v480_v22 = vadd.f32 %v479_v62, %v2680_v3  ;;  %v1933_v62 = vld [vmem:[%s2999_s3 + $0x164] sm:$0xf]  ;;  %1056 = vmatpush.bf16.msra.mxu3 %v1764_v58 }
  0xa9   :  { %v498_v4 = vpop.f32.mrf.mxu3  ;;  %v444_v9 = vadd.f32 %v443_v5, %v2628_v36  ;;  %v462_v10 = vpop.f32.mrf.mxu1  ;;  %v1752_v1 = vor.u32 %v1933_v62, %v1749_v63  ;;  %v1821_v5 = vld [vmem:[%s2999_s3 + $0x1f8] sm:$0xf0] }
  0xaa   :  { %v499_v39 = vadd.f32 %v498_v4, %v480_v22  ;;  %v1951_v4 = vld [vmem:[%s2999_s3 + $0x1f4] sm:$0xf]  ;;  %v1733_v22 = vld [vmem:[%s2999_s3 + $0x148] sm:$0xf0] }
  0xab   :  { %v463_v17 = vadd.f32 %v462_v10, %v444_v9  ;;  %1107 = vmatpush.bf16.msrb.mxu2 %v1752_v1  ;;  %v1824_v8 = vor.u32 %v1951_v4, %v1821_v5  ;;  %v1736_v23 = vor.u32 %v1929_v21, %v1733_v22  ;;  %v1781_v1 = vld [vmem:[%s2999_s3 + $0x1a8] sm:$0xf0] }
  0xac   :  { %v585_v56 = vmax.f32 %v499_v39, 0.0  ;;  %v1945_v39 = vld [vmem:[%s2999_s3 + $0x1c4] sm:$0xf]  ;;  %v1701_v4 = vld [vmem:[%s2999_s3 + $0x108] sm:$0xf0]  ;;  %v1784_v5 = vor.u32 %v1941_v25, %v1781_v1 }
  0xad   :  { %v588_v27 = vmax.f32 %v463_v17, 0.0  ;;  %1125 = vmatpush.bf16.msrb.mxu3 %v1824_v8  ;;  %v1765_v21 = vld [vmem:[%s2999_s3 + $0x188] sm:$0xf0] }
  0xaf   :  { %v2723_v32 = vpack.c.bf16 %v588_v27, %v584_v26  ;;  %v481_v33 = vpop.f32.mrf.mxu2  ;;  %1108 = vmatpush.bf16.msrb.mxu2 %v1744_v14  ;;  %v1947_v27 = vld [vmem:[%s2999_s3 + $0x1d4] sm:$0xf] }
  0xb0   :  { %v482_v40 = vadd.f32 %v481_v33, %v2680_v3  ;;  %v446_v42 = vpop.f32.mrf.mxu0  ;;  %v1808_v44 = vor.u32 %v1947_v27, %v1805_v28 }
  0xb1   :  { %v500_v41 = vpop.f32.mrf.mxu3  ;;  %v465_v46 = vpop.f32.mrf.mxu1  ;;  %1000 = vmatmul.bf16.vlgmr.msra.gmra.mxu0 %v2723_v32  ;;  %v447_v60 = vadd.f32 %v446_v42, %v2628_v36 }
  0xb2   :  { %v501_v51 = vadd.f32 %v500_v41, %v482_v40  ;;  %v1797_v40 = vld [vmem:[%s2999_s3 + $0x1c8] sm:$0xf0] }
  0xb3   :  { %v466_v9 = vadd.f32 %v465_v46, %v447_v60  ;;  %1109 = vmatpush.bf16.msrb.mxu2 %v1736_v23  ;;  %v1800_v43 = vor.u32 %v1945_v39, %v1797_v40  ;;  %v1717_v46 = vld [vmem:[%s2999_s3 + $0x128] sm:$0xf0]  ;;  %v1709_v60 = vld [vmem:[%s2999_s3 + $0x118] sm:$0xf0] }
  0xb4   :  { %v589_v57 = vmax.f32 %v501_v51, 0.0  ;;  %v1720_v50 = vor.u32 %v1925_v45, %v1717_v46  ;;  %v1943_v51 = vld [vmem:[%s2999_s3 + $0x1b4] sm:$0xf]  ;;  %v1712_v63 = vor.u32 %v1923_v59, %v1709_v60 }
  0xb5   :  { %v592_v19 = vmax.f32 %v466_v9, 0.0 }
  0xb6   :  { %v2764_v0 = vpack.c.bf16 %v589_v57, %v585_v56  ;;  %v1792_v56 = vor.u32 %v1943_v51, %v1789_v52 }
  0xb7   :  { %v484_v2 = vpop.f32.mrf.mxu2 }
  0xb8   :  { %1019 = vmatmul.bf16.vlgmr.msra.gmra.mxu1 %v2764_v0  ;;  %v448_v7 = vpop.f32.mrf.mxu0  ;;  %v485_v17 = vadd.f32 %v484_v2, %v2680_v3  ;;  %v1921_v2 = vld [vmem:[%s2999_s3 + $0x104] sm:$0xf] }
  0xb9   :  { %v503_v6 = vpop.f32.mrf.mxu3  ;;  %v449_v10 = vadd.f32 %v448_v7, %v2628_v36  ;;  %v467_v11 = vpop.f32.mrf.mxu1  ;;  %v1813_v36 = vld [vmem:[%s2999_s3 + $0x1e8] sm:$0xf0]  ;;  %v1773_v7 = vld [vmem:[%s2999_s3 + $0x198] sm:$0xf0]  ;;  %v1704_v9 = vor.u32 %v1921_v2, %v1701_v4 }
  0xba   :  { %v1816_v18 = vor.u32 %v1949_v16, %v1813_v36  ;;  %v504_v29 = vadd.f32 %v503_v6, %v485_v17  ;;  %v1939_v6 = vld [vmem:[%s2999_s3 + $0x194] sm:$0xf] }
  0xbb   :  { %v468_v15 = vadd.f32 %v467_v11, %v449_v10  ;;  %v1776_v13 = vor.u32 %v1939_v6, %v1773_v7 }
  0xbc   :  { %1126 = vmatpush.bf16.msrb.mxu3 %v1816_v18  ;;  %v593_v41 = vmax.f32 %v504_v29, 0.0 }
  0xbd   :  { %v596_v20 = vmax.f32 %v468_v15, 0.0 }
  0xbf   :  { %v486_v24 = vpop.f32.mrf.mxu2  ;;  %v2793_v26 = vpack.c.bf16 %v596_v20, %v592_v19  ;;  %v1937_v20 = vld [vmem:[%s2999_s3 + $0x184] sm:$0xf] }
  0xc0   :  { %v487_v30 = vadd.f32 %v486_v24, %v2680_v3  ;;  %1127 = vmatpush.bf16.msrb.mxu3 %v1808_v44  ;;  %v1728_v3 = vor.u32 %v1927_v35, %v1725_v34  ;;  %v1768_v23 = vor.u32 %v1937_v20, %v1765_v21 }
  0xc1   :  { %v505_v31 = vpop.f32.mrf.mxu3  ;;  %v536_v33 = vpop.f32.mrf.mxu1  ;;  %1005 = vmatmul.bf16.gmra.mxu0 %v2793_v26 }
  0xc2   :  { %v517_v49 = vpop.f32.mrf.mxu0  ;;  %v506_v37 = vadd.f32 %v505_v31, %v487_v30  ;;  %1110 = vmatpush.bf16.msrb.mxu2 %v1728_v3 }
  0xc3   :  { %v518_v47 = vadd.f32 %v517_v49, %v2810_v38 }
  0xc4   :  { %v597_v42 = vmax.f32 %v506_v37, 0.0  ;;  %1128 = vmatpush.bf16.msrb.mxu3 %v1800_v43 }
  0xc5   :  { %v537_v61 = vadd.f32 %v536_v33, %v518_v47 }
  0xc6   :  { %v2825_v48 = vpack.c.bf16 %v597_v42, %v593_v41  ;;  %1111 = vmatpush.bf16.msrb.mxu2 %v1720_v50 }
  0xc7   :  { %v555_v54 = vpop.f32.mrf.mxu2  ;;  %v586_v11 = vmax.f32 %v537_v61, 0.0 }
  0xc8   :  { %1024 = vmatmul.bf16.gmra.mxu1 %v2825_v48  ;;  %1129 = vmatpush.bf16.msrb.mxu3 %v1792_v56  ;;  %v556_v10 = vadd.f32 %v555_v54, %v2834_v53 }
  0xc9   :  { %v574_v55 = vpop.f32.mrf.mxu3  ;;  %v538_v58 = vpop.f32.mrf.mxu1 }
  0xca   :  { %v519_v57 = vpop.f32.mrf.mxu0  ;;  %1112 = vmatpush.bf16.msrb.mxu2 %v1712_v63  ;;  %v575_v36 = vadd.f32 %v574_v55, %v556_v10 }
  0xcb   :  { %v520_v62 = vadd.f32 %v519_v57, %v2810_v38 }
  0xcc   :  { %1130 = vmatpush.bf16.msrb.mxu3 %v1784_v5  ;;  %v587_v24 = vmax.f32 %v575_v36, 0.0 }
  0xcd   :  { %v539_v8 = vadd.f32 %v538_v58, %v520_v62 }
  0xce   :  { %1113 = vmatpush.bf16.msrb.mxu2 %v1704_v9 }
  0xcf   :  { %v590_v12 = vmax.f32 %v539_v8, 0.0  ;;  %v557_v15 = vpop.f32.mrf.mxu2  ;;  %v1152_v8 = vld [vmem:[%s3001_s4] sm:$0x3] }
  0xd0   :  { %v558_v17 = vadd.f32 %v557_v15, %v2834_v53  ;;  %1131 = vmatpush.bf16.msrb.mxu3 %v1776_v13  ;;  %v1964_v13 = vld [vmem:[%s2998_s0] sm:$0xff]  ;;  %v1154_v36 = vperm.slane %v1152_v8, 0 }
  0xd1   :  { %v602_v14 = vpack.c.bf16 %v590_v12, %v586_v11  ;;  %v576_v16 = vpop.f32.mrf.mxu3  ;;  %v541_v19 = vpop.f32.mrf.mxu1  ;;  %1076 = vmatmul.bf16.vlgmr.msrb.gmra.mxu0 %v2723_v32 }
  0xd2   :  { %v522_v18 = vpop.f32.mrf.mxu0  ;;  %v577_v22 = vadd.f32 %v576_v16, %v558_v17  ;;  %v1155_v17 = vperm.slane %v1152_v8, 1 }
  0xd3   :  { %1038 = vmatmul.bf16.vlgmr.msra.gmra.mxu2 %v602_v14  ;;  %v523_v28 = vadd.f32 %v522_v18, %v2810_v38 }
  0xd4   :  { %v591_v27 = vmax.f32 %v577_v22, 0.0  ;;  %1132 = vmatpush.bf16.msrb.mxu3 %v1768_v23 }
  0xd5   :  { %v542_v44 = vadd.f32 %v541_v19, %v523_v28  ;;  %v1965_v19 = vld [vmem:[%s2998_s0 + $0x8] sm:$0xff] }
  0xd6   :  { %v603_v29 = vpack.c.bf16 %v591_v27, %v587_v24 }
  0xd7   :  { %v560_v30 = vpop.f32.mrf.mxu2  ;;  %v594_v37 = vmax.f32 %v542_v44, 0.0 }
  0xd8   :  { %1095 = vmatmul.bf16.vlgmr.msrb.gmra.mxu1 %v2764_v0  ;;  %1057 = vmatmul.bf16.vlgmr.msra.gmra.mxu3 %v603_v29  ;;  %v561_v34 = vadd.f32 %v560_v30, %v2834_v53 }
  0xd9   :  { %v579_v32 = vpop.f32.mrf.mxu3  ;;  %v543_v33 = vpop.f32.mrf.mxu1 }
  0xda   :  { %v524_v31 = vpop.f32.mrf.mxu0  ;;  %v580_v41 = vadd.f32 %v579_v32, %v561_v34 }
  0xdb   :  { %v525_v49 = vadd.f32 %v524_v31, %v2810_v38  ;;  %v1966_v31 = vld [vmem:[%s2998_s0 + $0x10] sm:$0xff] }
  0xdc   :  { %v595_v45 = vmax.f32 %v580_v41, 0.0 }
  0xdd   :  { %v544_v35 = vadd.f32 %v543_v33, %v525_v49 }
  0xdf   :  { %v598_v3 = vmax.f32 %v544_v35, 0.0  ;;  %v562_v39 = vpop.f32.mrf.mxu2 }
  0xe0   :  { %v563_v42 = vadd.f32 %v562_v39, %v2834_v53 }
  0xe1   :  { %v606_v40 = vpack.c.bf16 %v598_v3, %v594_v37  ;;  %1081 = vmatmul.bf16.gmra.mxu0 %v2793_v26  ;;  %v581_v43 = vpop.f32.mrf.mxu3  ;;  %v1967_v37 = vld [vmem:[%s2998_s0 + $0x18] sm:$0xff] }
  0xe2   :  { %v582_v0 = vadd.f32 %v581_v43, %v563_v42 }
  0xe3   :  { %1043 = vmatmul.bf16.gmra.mxu2 %v606_v40 }
  0xe4   :  { %v599_v46 = vmax.f32 %v582_v0, 0.0 }
  0xe6   :  { %v607_v47 = vpack.c.bf16 %v599_v46, %v595_v45 }
  0xe8   :  { %1100 = vmatmul.bf16.gmra.mxu1 %v2825_v48  ;;  %1062 = vmatmul.bf16.gmra.mxu3 %v607_v47 }
  0xf3   :  { %1114 = vmatmul.bf16.vlgmr.msrb.gmra.mxu2 %v602_v14 }
  0xf8   :  { %1133 = vmatmul.bf16.vlgmr.msrb.gmra.mxu3 %v603_v29 }
 0x103   :  { %1119 = vmatmul.bf16.gmra.mxu2 %v606_v40 }
 0x108   :  { %1138 = vmatmul.bf16.gmra.mxu3 %v607_v47  ;;  %v1968_v47 = vld [vmem:[%s2998_s0 + $0x20] sm:$0xff] }
 0x12e   :  { %v1001_v50 = vpop.f32.mrf.mxu0 }
 0x135   :  { %v1020_v38 = vpop.f32.mrf.mxu1 }
 0x136   :  { %v1003_v52 = vpop.f32.mrf.mxu0  ;;  %v1021_v1 = vadd.f32 %v1020_v38, %v1001_v50 }
 0x13d   :  { %v1022_v51 = vpop.f32.mrf.mxu1 }
 0x13e   :  { %v1006_v56 = vpop.f32.mrf.mxu0  ;;  %v1023_v10 = vadd.f32 %v1022_v51, %v1003_v52 }
 0x145   :  { %v1025_v54 = vpop.f32.mrf.mxu1 }
 0x146   :  { %v1008_v60 = vpop.f32.mrf.mxu0  ;;  %v1026_v32 = vadd.f32 %v1025_v54, %v1006_v56 }
 0x14d   :  { %v1027_v59 = vpop.f32.mrf.mxu1 }
 0x14e   :  { %v1077_v62 = vpop.f32.mrf.mxu0  ;;  %v1028_v46 = vadd.f32 %v1027_v59, %v1008_v60 }
 0x155   :  { %v1096_v61 = vpop.f32.mrf.mxu1 }
 0x156   :  { %v1039_v53 = vpop.f32.mrf.mxu2  ;;  %v1097_v5 = vadd.f32 %v1096_v61, %v1077_v62  ;;  %v1079_v11 = vpop.f32.mrf.mxu0  ;;  %v1970_v62 = vld [vmem:[%s2998_s0 + $0x30] sm:$0xff] }
 0x157   :  { %v1040_v4 = vadd.f32 %v1039_v53, %v1021_v1  ;;  %v1969_v53 = vld [vmem:[%s2998_s0 + $0x28] sm:$0xff] }
 0x15b   :  { %v1058_v26 = vpop.f32.mrf.mxu3 }
 0x15c   :  { %v1059_v6 = vadd.f32 %v1058_v26, %v1040_v4 }
 0x15d   :  { %v1098_v7 = vpop.f32.mrf.mxu1 }
 0x15e   :  { %v1041_v55 = vpop.f32.mrf.mxu2  ;;  %v1144_v14 = vadd.f32 %v1964_v13, %v1059_v6  ;;  %v1099_v21 = vadd.f32 %v1098_v7, %v1079_v11  ;;  %v1082_v33 = vpop.f32.mrf.mxu0  ;;  %v1972_v7 = vmov 256.0  }
 0x15f   :  { %v1042_v18 = vadd.f32 %v1041_v55, %v1023_v10  ;;  %1954 = vrcp.f32 %v1972_v7 }
 0x160   :  { %v1158_v23 = vadd.f32 %v1154_v36, %v1144_v14 }
 0x163   :  { %v1060_v57 = vpop.f32.mrf.mxu3 }
 0x164   :  { %v1061_v22 = vadd.f32 %v1060_v57, %v1042_v18 }
 0x165   :  { %v1101_v29 = vpop.f32.mrf.mxu1  ;;  %v1955_v8 = vpop.eup %1954 }
 0x166   :  { %v1044_v58 = vpop.f32.mrf.mxu2  ;;  %v1146_v44 = vadd.f32 %v1966_v31, %v1061_v22  ;;  %v1102_v39 = vadd.f32 %v1101_v29, %v1082_v33  ;;  %v1084_v26 = vpop.f32.mrf.mxu0  ;;  %vm1183_vm0 = vweird.f32 %v1955_v8 }
 0x167   :  { %v1045_v34 = vadd.f32 %v1044_v58, %v1026_v32 }
 0x168   :  { %v1160_v41 = vadd.f32 %v1154_v36, %v1146_v44 }
 0x16b   :  { %v1063_v25 = vpop.f32.mrf.mxu3 }
 0x16c   :  { %v1064_v40 = vadd.f32 %v1063_v25, %v1045_v34 }
 0x16d   :  { %v1103_v51 = vpop.f32.mrf.mxu1 }
 0x16e   :  { %v1046_v48 = vpop.f32.mrf.mxu2  ;;  %v1148_v38 = vadd.f32 %v1968_v47, %v1064_v40  ;;  %v1104_v56 = vadd.f32 %v1103_v51, %v1084_v26  ;;  %v1273_v26 = vld [vmem:[%s3002_s5] sm:$0x3] }
 0x16f   :  { %v1047_v52 = vadd.f32 %v1046_v48, %v1028_v46 }
 0x170   :  { %v1162_v58 = vadd.f32 %v1154_v36, %v1148_v38 }
 0x173   :  { %v1065_v63 = vpop.f32.mrf.mxu3 }
 0x174   :  { %v1066_v57 = vadd.f32 %v1065_v63, %v1047_v52 }
 0x176   :  { %v1115_v2 = vpop.f32.mrf.mxu2  ;;  %v1150_v1 = vadd.f32 %v1970_v62, %v1066_v57 }
 0x177   :  { %v1116_v9 = vadd.f32 %v1115_v2, %v1097_v5  ;;  %v1971_v2 = vld [vmem:[%s2998_s0 + $0x38] sm:$0xff] }
 0x178   :  { %v1164_v5 = vadd.f32 %v1154_v36, %v1150_v1 }
 0x17b   :  { %v1134_v12 = vpop.f32.mrf.mxu3 }
 0x17c   :  { %v1135_v15 = vadd.f32 %v1134_v12, %v1116_v9  ;;  %v1179_v9 = vmul.f32 256.0, %v1955_v8 }
 0x17e   :  { %v1117_v16 = vpop.f32.mrf.mxu2  ;;  %v1145_v20 = vadd.f32 %v1965_v19, %v1135_v15  ;;  %v1180_v10 = vsub.f32 1.0, %v1179_v9 }
 0x17f   :  { %v1118_v27 = vadd.f32 %v1117_v16, %v1099_v21 }
 0x180   :  { %v1159_v24 = vadd.f32 %v1155_v17, %v1145_v20  ;;  %v1181_v11 = vmul.f32 %v1955_v8, %v1180_v10 }
 0x182   :  { %v1166_v28 = vadd.f32 %v1159_v24, %v1158_v23  ;;  %v1182_v12 = vadd.f32 %v1955_v8, %v1181_v11 }
 0x183   :  { %v1136_v30 = vpop.f32.mrf.mxu3 }
 0x184   :  { %v1137_v49 = vadd.f32 %v1136_v30, %v1118_v27  ;;  %1167 = vadd.xlane.f32.xlu0 %v1166_v28  ;;  %v2905_v13 = vsel %vm1183_vm0, %v1955_v8, %v1182_v12 }
 0x186   :  { %v1120_v35 = vpop.f32.mrf.mxu2  ;;  %v1147_v3 = vadd.f32 %v1967_v37, %v1137_v49 }
 0x187   :  { %v1121_v43 = vadd.f32 %v1120_v35, %v1102_v39 }
 0x188   :  { %v1161_v42 = vadd.f32 %v1155_v17, %v1147_v3 }
 0x18a   :  { %v1169_v0 = vadd.f32 %v1161_v42, %v1160_v41 }
 0x18b   :  { %v1139_v45 = vpop.f32.mrf.mxu3 }
 0x18c   :  { %v1140_v50 = vadd.f32 %v1139_v45, %v1121_v43  ;;  %1170 = vadd.xlane.f32.xlu0 %v1169_v0 }
 0x18e   :  { %v1149_v54 = vadd.f32 %v1969_v53, %v1140_v50  ;;  %v1122_v55 = vpop.f32.mrf.mxu2 }
 0x18f   :  { %v1123_v60 = vadd.f32 %v1122_v55, %v1104_v56 }
 0x190   :  { %v1163_v59 = vadd.f32 %v1155_v17, %v1149_v54 }
 0x192   :  { %v1172_v25 = vadd.f32 %v1163_v59, %v1162_v58 }
 0x193   :  { %v1141_v61 = vpop.f32.mrf.mxu3 }
 0x194   :  { %v1142_v48 = vadd.f32 %v1141_v61, %v1123_v60  ;;  %1173 = vadd.xlane.f32.xlu1 %v1172_v25  ;;  %v2952_v25 = vperm.slane %v1273_v26, 0  ;;  %v2954_v61 = vperm.slane %v1273_v26, 1 }
 0x196   :  { %v1151_v4 = vadd.f32 %v1971_v2, %v1142_v48 }
 0x198   :  { %v1165_v6 = vadd.f32 %v1155_v17, %v1151_v4 }
 0x19a   :  { %v1175_v63 = vadd.f32 %v1165_v6, %v1164_v5 }
 0x19c   :  { %1176 = vadd.xlane.f32.xlu1 %v1175_v63 }
 0x1f7   :  { %v1168_v14 = vpop.xlane.xlu0 %1167 }
 0x1f8   :  { %v1185_v15 = vmul.f32 %v2905_v13, %v1168_v14 }
 0x1fa   :  { %v2908_v16 = vsub.f32 %v1158_v23, %v1185_v15  ;;  %v2910_v18 = vsub.f32 %v1159_v24, %v1185_v15 }
 0x1fc   :  { %v1197_v36 = vmul.f32 %v2908_v16, %v2908_v16  ;;  %v1198_v17 = vmul.f32 %v2910_v18, %v2910_v18 }
 0x1fe   :  { %v1205_v19 = vadd.f32 %v1198_v17, %v1197_v36 }
 0x1ff   :  { %v1171_v20 = vpop.xlane.xlu0 %1170 }
 0x200   :  { %v1186_v21 = vmul.f32 %v2905_v13, %v1171_v20  ;;  %1206 = vadd.xlane.f32.xlu2 %v1205_v19 }
 0x202   :  { %v2917_v22 = vsub.f32 %v1160_v41, %v1186_v21  ;;  %v2919_v27 = vsub.f32 %v1161_v42, %v1186_v21 }
 0x204   :  { %v1199_v23 = vmul.f32 %v2917_v22, %v2917_v22  ;;  %v1200_v24 = vmul.f32 %v2919_v27, %v2919_v27 }
 0x206   :  { %v1208_v28 = vadd.f32 %v1200_v24, %v1199_v23 }
 0x207   :  { %v1174_v29 = vpop.xlane.xlu1 %1173 }
 0x208   :  { %v1187_v30 = vmul.f32 %v2905_v13, %v1174_v29  ;;  %1209 = vadd.xlane.f32.xlu2 %v1208_v28 }
 0x20a   :  { %v2926_v32 = vsub.f32 %v1162_v58, %v1187_v30  ;;  %v2928_v31 = vsub.f32 %v1163_v59, %v1187_v30  ;;  %v1287_v58 = vld [vmem:[%s3003_s6] sm:$0x3] }
 0x20b   :  { %v1289_v48 = vperm.slane %v1287_v58, 0  ;;  %v1290_v2 = vperm.slane %v1287_v58, 1 }
 0x20c   :  { %v1201_v44 = vmul.f32 %v2926_v32, %v2926_v32  ;;  %v1202_v49 = vmul.f32 %v2928_v31, %v2928_v31 }
 0x20e   :  { %v1211_v33 = vadd.f32 %v1202_v49, %v1201_v44 }
 0x20f   :  { %v1177_v35 = vpop.xlane.xlu1 %1176 }
 0x210   :  { %v1188_v34 = vmul.f32 %v2905_v13, %v1177_v35  ;;  %1212 = vadd.xlane.f32.xlu0 %v1211_v33 }
 0x212   :  { %v2935_v37 = vsub.f32 %v1164_v5, %v1188_v34  ;;  %v2937_v3 = vsub.f32 %v1165_v6, %v1188_v34 }
 0x214   :  { %v1203_v39 = vmul.f32 %v2935_v37, %v2935_v37  ;;  %v1204_v40 = vmul.f32 %v2937_v3, %v2937_v3 }
 0x216   :  { %v1214_v41 = vadd.f32 %v1204_v40, %v1203_v39 }
 0x218   :  { %1215 = vadd.xlane.f32.xlu1 %v1214_v41 }
 0x273   :  { %v1207_v42 = vpop.xlane.xlu2 %1206 }
 0x274   :  { %v1217_v43 = vmul.f32 %v1207_v42, %v2905_v13 }
 0x276   :  { %v1221_v0 = vadd.f32 1e-05, %v1217_v43 }
 0x278   :  { %1956 = vrsqrt.f32 %v1221_v0  ;;  %vm1231_vm2 = vweird.f32 %v1221_v0 }
 0x27b   :  { %v1210_v45 = vpop.xlane.xlu2 %1209 }
 0x27c   :  { %v1218_v46 = vmul.f32 %v1210_v45, %v2905_v13 }
 0x27e   :  { %v1957_v47 = vpop.eup %1956  ;;  %v1222_v38 = vadd.f32 1e-05, %v1218_v46 }
 0x27f   :  { %v1226_v50 = vmul.f32 %v1957_v47, %v1221_v0  ;;  %vm1232_vm1 = vweird.f32 %v1957_v47 }
 0x280   :  { %1958 = vrsqrt.f32 %v1222_v38  ;;  %vm1233_vm3 = vmor %vm1231_vm2, %vm1232_vm1  ;;  %vm1241_vm5 = vweird.f32 %v1222_v38 }
 0x281   :  { %v1227_v51 = vmul.f32 %v1957_v47, %v1226_v50 }
 0x283   :  { %v1228_v52 = vmul.f32 0.5, %v1227_v51  ;;  %v1213_v53 = vpop.xlane.xlu0 %1212 }
 0x284   :  { %v1219_v54 = vmul.f32 %v1213_v53, %v2905_v13 }
 0x285   :  { %v1229_v55 = vsub.f32 1.5, %v1228_v52 }
 0x286   :  { %v1959_v56 = vpop.eup %1958  ;;  %v1223_v57 = vadd.f32 1e-05, %v1219_v54 }
 0x287   :  { %v1230_v59 = vmul.f32 %v1957_v47, %v1229_v55  ;;  %v1236_v60 = vmul.f32 %v1959_v56, %v1222_v38  ;;  %vm1242_vm4 = vweird.f32 %v1959_v56 }
 0x288   :  { %1960 = vrsqrt.f32 %v1223_v57  ;;  %vm1243_vm6 = vmor %vm1241_vm5, %vm1242_vm4  ;;  %vm1251_vm8 = vweird.f32 %v1223_v57 }
 0x289   :  { %v1234_v62 = vsel %vm1233_vm3, %v1957_v47, %v1230_v59  ;;  %v1237_v1 = vmul.f32 %v1959_v56, %v1236_v60 }
 0x28a   :  { %v1265_v4 = vmul.f32 %v1234_v62, %v2908_v16  ;;  %v1266_v5 = vmul.f32 %v1234_v62, %v2910_v18 }
 0x28b   :  { %v1238_v6 = vmul.f32 0.5, %v1237_v1  ;;  %v1216_v63 = vpop.xlane.xlu1 %1215 }
 0x28c   :  { %v1279_v7 = vmul.f32 %v2952_v25, %v1265_v4  ;;  %v1280_v8 = vmul.f32 %v2954_v61, %v1266_v5  ;;  %v1220_v9 = vmul.f32 %v1216_v63, %v2905_v13 }
 0x28d   :  { %v1239_v10 = vsub.f32 1.5, %v1238_v6 }
 0x28e   :  { %v1961_v11 = vpop.eup %1960  ;;  %v1293_v12 = vadd.f32 %v1289_v48, %v1279_v7  ;;  %v1294_v14 = vadd.f32 %v1290_v2, %v1280_v8  ;;  %v1224_v15 = vadd.f32 1e-05, %v1220_v9 }
 0x28f   :  { %v1240_v36 = vmul.f32 %v1959_v56, %v1239_v10  ;;  %v1246_v17 = vmul.f32 %v1961_v11, %v1223_v57  ;;  %vm1252_vm7 = vweird.f32 %v1961_v11 }
 0x290   :  { %1301 = vst [vmem:[%s3004_s7] sm:$0xff] %v1293_v12  ;;  %1962 = vrsqrt.f32 %v1224_v15  ;;  %vm1253_vm9 = vmor %vm1251_vm8, %vm1252_vm7  ;;  %vm1261_vm11 = vweird.f32 %v1224_v15 }
 0x291   :  { %1302 = vst [vmem:[%s3004_s7 + $0x8] sm:$0xff] %v1294_v14  ;;  %v1244_v13 = vsel %vm1243_vm6, %v1959_v56, %v1240_v36  ;;  %v1247_v16 = vmul.f32 %v1961_v11, %v1246_v17 }
 0x292   :  { %v1267_v18 = vmul.f32 %v1244_v13, %v2917_v22  ;;  %v1268_v19 = vmul.f32 %v1244_v13, %v2919_v27 }
 0x293   :  { %v1248_v20 = vmul.f32 0.5, %v1247_v16 }
 0x294   :  { %v1281_v21 = vmul.f32 %v2952_v25, %v1267_v18  ;;  %v1282_v23 = vmul.f32 %v2954_v61, %v1268_v19 }
 0x295   :  { %v1249_v24 = vsub.f32 1.5, %v1248_v20 }
 0x296   :  { %v1963_v28 = vpop.eup %1962  ;;  %v1295_v29 = vadd.f32 %v1289_v48, %v1281_v21  ;;  %v1296_v30 = vadd.f32 %v1290_v2, %v1282_v23 }
 0x297   :  { %v1250_v44 = vmul.f32 %v1961_v11, %v1249_v24  ;;  %v1256_v49 = vmul.f32 %v1963_v28, %v1224_v15  ;;  %vm1262_vm10 = vweird.f32 %v1963_v28 }
 0x298   :  { %1303 = vst [vmem:[%s3004_s7 + $0x10] sm:$0xff] %v1295_v29  ;;  %vm1263_vm12 = vmor %vm1261_vm11, %vm1262_vm10 }
 0x299   :  { %1304 = vst [vmem:[%s3004_s7 + $0x18] sm:$0xff] %v1296_v30  ;;  %v1254_v22 = vsel %vm1253_vm9, %v1961_v11, %v1250_v44  ;;  %v1257_v27 = vmul.f32 %v1963_v28, %v1256_v49 }
 0x29a   :  { %v1269_v33 = vmul.f32 %v1254_v22, %v2926_v32  ;;  %v1270_v35 = vmul.f32 %v1254_v22, %v2928_v31 }
 0x29b   :  { %v1258_v34 = vmul.f32 0.5, %v1257_v27 }
 0x29c   :  { %v1283_v39 = vmul.f32 %v2952_v25, %v1269_v33  ;;  %v1284_v40 = vmul.f32 %v2954_v61, %v1270_v35 }
 0x29d   :  { %v1259_v41 = vsub.f32 1.5, %v1258_v34 }
 0x29e   :  { %v1297_v42 = vadd.f32 %v1289_v48, %v1283_v39  ;;  %v1298_v43 = vadd.f32 %v1290_v2, %v1284_v40 }
 0x29f   :  { %v1260_v0 = vmul.f32 %v1963_v28, %v1259_v41 }
 0x2a0   :  { %1305 = vst [vmem:[%s3004_s7 + $0x20] sm:$0xff] %v1297_v42 }
 0x2a1   :  { %1306 = vst [vmem:[%s3004_s7 + $0x28] sm:$0xff] %v1298_v43  ;;  %v1264_v32 = vsel %vm1263_vm12, %v1963_v28, %v1260_v0 }
 0x2a2   :  { %v1271_v31 = vmul.f32 %v1264_v32, %v2935_v37  ;;  %v1272_v45 = vmul.f32 %v1264_v32, %v2937_v3 }
 0x2a4   :  { %v1285_v46 = vmul.f32 %v2952_v25, %v1271_v31  ;;  %v1286_v47 = vmul.f32 %v2954_v61, %v1272_v45 }
 0x2a6   :  { %v1299_v38 = vadd.f32 %v1289_v48, %v1285_v46  ;;  %v1300_v50 = vadd.f32 %v1290_v2, %v1286_v47 }
 0x2a8   :  { %1307 = vst [vmem:[%s3004_s7 + $0x30] sm:$0xff] %v1299_v38 }
 0x2a9   :  { %1308 = vst [vmem:[%s3004_s7 + $0x38] sm:$0xff] %v1300_v50 }

</bundles_post_ra>
